<compile_context>
chip_gen: v7x
topology: tpu7x:2x2x1
jax: 0.10.0
libtpu: 0.0.40
codegen_flags: <defaults>
</compile_context>

<pallas_src>
import functools
import math

import jax
import jax.numpy as jnp
from jax.experimental import pallas as pl
from jax.experimental.pallas import tpu as pltpu

_VMEM_LIMIT = 32 * 1024 * 1024   # explicit, safe on v5e/v6e/v7x
_NEG_INF = -1e30                 # finite mask value: avoids inf-inf -> NaN


def _pick_tile(dim, pref, align):
    """Largest tile <= pref that divides dim and is a multiple of align,
    else the full dim (full-extent blocks need no (8,128) alignment)."""
    if dim <= pref:
        return dim
    t = (min(pref, dim) // align) * align
    while t >= align:
        if dim % t == 0:
            return t
        t -= align
    return dim


# --------------------------- tiled linear (+GELU) ---------------------------

def _linear_kernel(x_ref, w_ref, b_ref, o_ref, acc_ref, *, activation):
    @pl.when(pl.program_id(2) == 0)
    def _():
        acc_ref[...] = jnp.zeros_like(acc_ref)

    acc_ref[...] += jnp.dot(x_ref[...], w_ref[...],
                            preferred_element_type=jnp.float32)

    @pl.when(pl.program_id(2) == pl.num_programs(2) - 1)
    def _():
        y = acc_ref[...] + b_ref[...]
        if activation == "gelu":
            # tanh-approximation GELU (matches the from-scratch GELU used by
            # the reference `ff`; exact-erf nn.GELU differs at ~1e-3).
            y = 0.5 * y * (1.0 + jnp.tanh(
                0.7978845608028654 * (y + 0.044715 * y * y * y)))
        o_ref[...] = y.astype(o_ref.dtype)


def linear(x2d, w, b, activation=None, *, tm=256, tn=256, tk=512):
    """x2d: (M, K), w: (K, N), b: (N,) -> (M, N), tiled with K-reduction."""
    M, K = x2d.shape
    K2, N = w.shape
    assert K == K2
    tm = _pick_tile(M, tm, 8)
    tn = _pick_tile(N, tn, 128)
    tk = _pick_tile(K, tk, 128)
    grid = (M // tm, N // tn, K // tk)
    return pl.pallas_call(
        functools.partial(_linear_kernel, activation=activation),
        out_shape=jax.ShapeDtypeStruct((M, N), x2d.dtype),
        grid_spec=pltpu.PrefetchScalarGridSpec(
            num_scalar_prefetch=0,
            grid=grid,
            in_specs=[
                pl.BlockSpec((tm, tk), lambda i, j, k: (i, k)),
                pl.BlockSpec((tk, tn), lambda i, j, k: (k, j)),
                pl.BlockSpec((1, tn), lambda i, j, k: (0, j)),
            ],
            out_specs=pl.BlockSpec((tm, tn), lambda i, j, k: (i, j)),
            scratch_shapes=[pltpu.VMEM((tm, tn), jnp.float32)],
        ),
        compiler_params=pltpu.CompilerParams(
            dimension_semantics=("parallel", "parallel", "arbitrary"),
            vmem_limit_bytes=_VMEM_LIMIT),
    )(x2d, w, b.reshape(1, N))


# ---------------- tiled linear fused with residual-add + LayerNorm ----------

def _linear_add_ln_kernel(x_ref, w_ref, b_ref, res_ref, g_ref, bb_ref,
                          o_ref, acc_ref, *, eps):
    @pl.when(pl.program_id(1) == 0)
    def _():
        acc_ref[...] = jnp.zeros_like(acc_ref)

    acc_ref[...] += jnp.dot(x_ref[...], w_ref[...],
                            preferred_element_type=jnp.float32)

    @pl.when(pl.program_id(1) == pl.num_programs(1) - 1)
    def _():
        h = acc_ref[...] + b_ref[...] + res_ref[...].astype(jnp.float32)
        mu = jnp.mean(h, axis=-1, keepdims=True)
        var = jnp.mean(jnp.square(h - mu), axis=-1, keepdims=True)  # biased
        nrm = (h - mu) * jax.lax.rsqrt(var + eps)
        o_ref[...] = (nrm * g_ref[...] + bb_ref[...]).astype(o_ref.dtype)


def linear_add_layernorm(x2d, w, b, res2d, gamma, beta, eps, *, tm=256, tk=512):
    """LayerNorm(res + (x @ w + b)) with the LN reduction over the full N."""
    M, K = x2d.shape
    _, N = w.shape
    tm = _pick_tile(M, tm, 8)
    tk = _pick_tile(K, tk, 128)
    grid = (M // tm, K // tk)
    return pl.pallas_call(
        functools.partial(_linear_add_ln_kernel, eps=eps),
        out_shape=jax.ShapeDtypeStruct((M, N), x2d.dtype),
        grid_spec=pltpu.PrefetchScalarGridSpec(
            num_scalar_prefetch=0,
            grid=grid,
            in_specs=[
                pl.BlockSpec((tm, tk), lambda i, k: (i, k)),
                pl.BlockSpec((tk, N), lambda i, k: (k, 0)),
                pl.BlockSpec((1, N), lambda i, k: (0, 0)),
                pl.BlockSpec((tm, N), lambda i, k: (i, 0)),
                pl.BlockSpec((1, N), lambda i, k: (0, 0)),
                pl.BlockSpec((1, N), lambda i, k: (0, 0)),
            ],
            out_specs=pl.BlockSpec((tm, N), lambda i, k: (i, 0)),
            scratch_shapes=[pltpu.VMEM((tm, N), jnp.float32)],
        ),
        compiler_params=pltpu.CompilerParams(
            dimension_semantics=("parallel", "arbitrary"),
            vmem_limit_bytes=_VMEM_LIMIT),
    )(x2d, w, b.reshape(1, N), res2d, gamma.reshape(1, N), beta.reshape(1, N))


# ------------------------ flash attention (all heads) -----------------------

def _flash_attn_kernel(q_ref, k_ref, v_ref, o_ref, m_ref, l_ref, acc_ref,
                       *, causal, blk_q, blk_kv):
    qi = pl.program_id(1)
    ki = pl.program_id(2)

    @pl.when(ki == 0)
    def _():
        m_ref[...] = jnp.full_like(m_ref, _NEG_INF)
        l_ref[...] = jnp.zeros_like(l_ref)
        acc_ref[...] = jnp.zeros_like(acc_ref)

    def update():
        q = q_ref[0]    # (H, blk_q, Dh); 1/sqrt(Dh) already folded into Wq
        k = k_ref[0]    # (H, blk_kv, Dh)
        v = v_ref[0]    # (H, blk_kv, Dh)
        s = jnp.einsum('hqd,hkd->hqk', q, k,
                       preferred_element_type=jnp.float32)   # (H, blk_q, blk_kv)
        if causal:
            rows = qi * blk_q + jax.lax.broadcasted_iota(
                jnp.int32, (blk_q, blk_kv), 0)
            cols = ki * blk_kv + jax.lax.broadcasted_iota(
                jnp.int32, (blk_q, blk_kv), 1)
            s = jnp.where(cols > rows, _NEG_INF, s)
        m_prev = m_ref[...]
        m_new = jnp.maximum(m_prev, jnp.max(s, axis=-1, keepdims=True))
        alpha = jnp.exp(m_prev - m_new)
        p = jnp.exp(s - m_new)
        l_ref[...] = alpha * l_ref[...] + jnp.sum(p, axis=-1, keepdims=True)
        acc_ref[...] = alpha * acc_ref[...] + jnp.einsum(
            'hqk,hkd->hqd', p.astype(v.dtype), v,
            preferred_element_type=jnp.float32)
        m_ref[...] = m_new

    if causal:
        # Skip kv blocks that lie entirely above the diagonal of this q block.
        @pl.when(ki * blk_kv <= qi * blk_q + (blk_q - 1))
        def _():
            update()
    else:
        update()

    @pl.when(ki == pl.num_programs(2) - 1)
    def _():
        inv_l = pl.reciprocal(l_ref[...], approx=True)
        o_ref[0] = (acc_ref[...] * inv_l).astype(o_ref.dtype)


def flash_attention(q, k, v, causal, *, blk_q=256, blk_kv=256):
    """q: (B, H, Sq, Dh), k/v: (B, H, Skv, Dh) -> (B, H, Sq, Dh)."""
    B, H, Sq, Dh = q.shape
    Skv = k.shape[2]
    blk_q = _pick_tile(Sq, blk_q, 8)
    blk_kv = _pick_tile(Skv, blk_kv, 8)
    grid = (B, Sq // blk_q, Skv // blk_kv)
    return pl.pallas_call(
        functools.partial(_flash_attn_kernel, causal=causal,
                          blk_q=blk_q, blk_kv=blk_kv),
        out_shape=jax.ShapeDtypeStruct((B, H, Sq, Dh), q.dtype),
        grid_spec=pltpu.PrefetchScalarGridSpec(
            num_scalar_prefetch=0,
            grid=grid,
            in_specs=[
                pl.BlockSpec((1, H, blk_q, Dh), lambda b, i, j: (b, 0, i, 0)),
                pl.BlockSpec((1, H, blk_kv, Dh), lambda b, i, j: (b, 0, j, 0)),
                pl.BlockSpec((1, H, blk_kv, Dh), lambda b, i, j: (b, 0, j, 0)),
            ],
            out_specs=pl.BlockSpec((1, H, blk_q, Dh),
                                   lambda b, i, j: (b, 0, i, 0)),
            scratch_shapes=[
                pltpu.VMEM((H, blk_q, 1), jnp.float32),    # running max
                pltpu.VMEM((H, blk_q, 1), jnp.float32),    # running denom
                pltpu.VMEM((H, blk_q, Dh), jnp.float32),   # output accumulator
            ],
        ),
        compiler_params=pltpu.CompilerParams(
            dimension_semantics=("parallel", "parallel", "arbitrary"),
            vmem_limit_bytes=_VMEM_LIMIT),
    )(q, k, v)


# ------------------------------ module glue ---------------------------------

def mha_self(x, p, num_heads):
    """Causal self-attention, returns the pre-output-projection context."""
    B, S, D = x.shape
    H = num_heads
    Dh = D // H
    qkv = linear(x.reshape(B * S, D), p["w_qkv"], p["b_qkv"])       # (B*S, 3D)
    qkv = qkv.reshape(B, S, 3, H, Dh).transpose(2, 0, 3, 1, 4)      # (3,B,H,S,Dh)
    q, k, v = qkv[0], qkv[1], qkv[2]
    o = flash_attention(q, k, v, causal=True)                       # (B,H,S,Dh)
    return o.transpose(0, 2, 1, 3).reshape(B * S, D)


def mha_cross(x, y, p, num_heads):
    """Cross-attention (no mask), returns the pre-output-projection context."""
    B, S, D = x.shape
    Sk = y.shape[1]
    H = num_heads
    Dh = D // H
    q = linear(x.reshape(B * S, D), p["wq"], p["bq"])                # (B*S, D)
    kv = linear(y.reshape(B * Sk, D), p["w_kv"], p["b_kv"])          # (B*Sk, 2D)
    q = q.reshape(B, S, H, Dh).transpose(0, 2, 1, 3)
    kv = kv.reshape(B, Sk, 2, H, Dh).transpose(2, 0, 3, 1, 4)
    k, v = kv[0], kv[1]
    o = flash_attention(q, k, v, causal=False)
    return o.transpose(0, 2, 1, 3).reshape(B * S, D)


def decoder_layer(x, y, params, num_heads, epsilon):
    # TODO(synk): dropout_rate is ignored (eval-mode identity).
    B, S, D = x.shape
    xf = x.reshape(B * S, D)

    # causal self-attention; out-proj fused with residual-add + LayerNorm1
    sa = params["self_attn"]
    ctx = mha_self(x, sa, num_heads)
    xf = linear_add_layernorm(ctx, sa["wo"], sa["bo"], xf,
                              params["ln1_g"], params["ln1_b"], epsilon)

    # cross-attention; out-proj fused with residual-add + LayerNorm2
    if y is not None:
        ca = params["cross_attn"]
        ctx = mha_cross(xf.reshape(B, S, D), y, ca, num_heads)
        xf = linear_add_layernorm(ctx, ca["wo"], ca["bo"], xf,
                                  params["ln2_g"], params["ln2_b"], epsilon)

    # feedforward: w1 + GELU, then w2 fused with residual-add + LayerNorm3
    h = linear(xf, params["ff"]["w1"], params["ff"]["b1"], activation="gelu")
    xf = linear_add_layernorm(h, params["ff"]["w2"], params["ff"]["b2"], xf,
                              params["ln3_g"], params["ln3_b"], epsilon)
    return xf.reshape(B, S, D)


def init_params(key, D, num_heads, scaling_value, qkv_bias=True):
    assert D % num_heads == 0
    hidden = scaling_value * D
    Dh = D // num_heads
    scale = 1.0 / math.sqrt(Dh)          # folded into Wq/bq (zero runtime cost)
    keys = jax.random.split(key, 16)
    std = 0.02

    def w(k, shape):
        return (std * jax.random.normal(k, shape)).astype(jnp.float32)

    def b(k, n):
        if qkv_bias:
            return (std * jax.random.normal(k, (n,))).astype(jnp.float32)
        return jnp.zeros((n,), jnp.float32)

    # self-attention: fused [Wq*scale | Wk | Wv]
    wq, wk, wv = w(keys[0], (D, D)), w(keys[1], (D, D)), w(keys[2], (D, D))
    bq, bk, bv = b(keys[3], D), b(keys[4], D), b(keys[5], D)
    self_attn = {
        "w_qkv": jnp.concatenate([wq * scale, wk, wv], axis=1),
        "b_qkv": jnp.concatenate([bq * scale, bk, bv]),
        "wo": w(keys[6], (D, D)), "bo": jnp.zeros((D,), jnp.float32),
    }
    # cross-attention: Wq*scale separate (source x), fused [Wk | Wv] (source y)
    cwq, cwk, cwv = w(keys[7], (D, D)), w(keys[8], (D, D)), w(keys[9], (D, D))
    cbq, cbk, cbv = b(keys[10], D), b(keys[11], D), b(keys[12], D)
    cross_attn = {
        "wq": cwq * scale, "bq": cbq * scale,
        "w_kv": jnp.concatenate([cwk, cwv], axis=1),
        "b_kv": jnp.concatenate([cbk, cbv]),
        "wo": w(keys[13], (D, D)), "bo": jnp.zeros((D,), jnp.float32),
    }
    return {
        "self_attn": self_attn,
        "cross_attn": cross_attn,
        "ff": {
            "w1": w(keys[14], (D, hidden)), "b1": jnp.zeros((hidden,), jnp.float32),
            "w2": w(keys[15], (hidden, D)), "b2": jnp.zeros((D,), jnp.float32),
        },
        "ln1_g": jnp.ones((D,), jnp.float32), "ln1_b": jnp.zeros((D,), jnp.float32),
        "ln2_g": jnp.ones((D,), jnp.float32), "ln2_b": jnp.zeros((D,), jnp.float32),
        "ln3_g": jnp.ones((D,), jnp.float32), "ln3_b": jnp.zeros((D,), jnp.float32),
    }


# --------------------------- pure-JAX reference ------------------------------

def reference_decoder_layer(x, y, p, num_heads, eps):
    def ln(h, g, b):
        mu = h.mean(-1, keepdims=True)
        var = ((h - mu) ** 2).mean(-1, keepdims=True)
        return (h - mu) / jnp.sqrt(var + eps) * g + b

    def gelu(v):
        return 0.5 * v * (1.0 + jnp.tanh(
            0.7978845608028654 * (v + 0.044715 * v ** 3)))

    def heads(t, B, S, D):
        H = num_heads
        return t.reshape(B, S, H, D // H).transpose(0, 2, 1, 3)

    def attn(xq, xkv, wq, bq, wk, bk, wv, bv, wo, bo, causal):
        B, S, D = xq.shape
        Sk = xkv.shape[1]
        q = heads(xq @ wq + bq, B, S, D)      # scale already folded into wq/bq
        k = heads(xkv @ wk + bk, B, Sk, D)
        v = heads(xkv @ wv + bv, B, Sk, D)
        s = jnp.einsum('bhqd,bhkd->bhqk', q, k)
        if causal:
            mask = jnp.triu(jnp.ones((S, Sk), dtype=bool), 1)
            s = jnp.where(mask, -jnp.inf, s)
        a = jax.nn.softmax(s, axis=-1)
        o = jnp.einsum('bhqk,bhkd->bhqd', a, v)
        o = o.transpose(0, 2, 1, 3).reshape(B, S, D)
        return o @ wo + bo

    B, S, D = x.shape
    sa = p["self_attn"]
    wq, wk, wv = sa["w_qkv"][:, :D], sa["w_qkv"][:, D:2 * D], sa["w_qkv"][:, 2 * D:]
    bq, bk, bv = sa["b_qkv"][:D], sa["b_qkv"][D:2 * D], sa["b_qkv"][2 * D:]
    h = ln(x + attn(x, x, wq, bq, wk, bk, wv, bv, sa["wo"], sa["bo"], True),
           p["ln1_g"], p["ln1_b"])
    if y is not None:
        ca = p["cross_attn"]
        wk2, wv2 = ca["w_kv"][:, :D], ca["w_kv"][:, D:]
        bk2, bv2 = ca["b_kv"][:D], ca["b_kv"][D:]
        h = ln(h + attn(h, y, ca["wq"], ca["bq"], wk2, bk2, wv2, bv2,
                        ca["wo"], ca["bo"], False), p["ln2_g"], p["ln2_b"])
    f = gelu(h @ p["ff"]["w1"] + p["ff"]["b1"]) @ p["ff"]["w2"] + p["ff"]["b2"]
    return ln(h + f, p["ln3_g"], p["ln3_b"])


if __name__ == "__main__":
    B, S, D = 2, 8, 32
    num_heads = 4
    scaling_value = 4
    epsilon = 1e-5

    key = jax.random.PRNGKey(0)
    kx, ky, kp = jax.random.split(key, 3)
    x = jax.random.normal(kx, (B, S, D), dtype=jnp.float32)
    y = jax.random.normal(ky, (B, S, D), dtype=jnp.float32)
    params = init_params(kp, D, num_heads, scaling_value, qkv_bias=True)

    fwd = jax.jit(functools.partial(decoder_layer, num_heads=num_heads,
                                    epsilon=epsilon))
    out = jax.block_until_ready(fwd(x, y, params))
    assert out.shape == (B, S, D)
    assert bool(jnp.all(jnp.isfinite(out)))

    ref = reference_decoder_layer(x, y, params, num_heads, epsilon)
    max_err = float(jnp.max(jnp.abs(out - ref)))
    assert max_err < 2e-2, f"mismatch vs reference: {max_err}"

    print("KERNEL_OK")
</pallas_src>

<mosaic_0001>
module attributes {stable_mosaic.version = 11 : i64} {
  func.func @_linear_kernel(%arg0: i32, %arg1: i32, %arg2: i32, %arg3: memref<16x32xf32, #tpu.memory_space<vmem>>, %arg4: memref<32x96xf32, #tpu.memory_space<vmem>>, %arg5: memref<1x96xf32, #tpu.memory_space<vmem>>, %arg6: memref<16x96xf32, #tpu.memory_space<vmem>>, %arg7: memref<16x96xf32, #tpu.memory_space<vmem>>) attributes {dimension_semantics = [#tpu.dimension_semantics<parallel>, #tpu.dimension_semantics<parallel>, #tpu.dimension_semantics<arbitrary>], iteration_bounds = array<i64: 1, 1, 1>, scalar_prefetch = 0 : i64, scratch_operands = 1 : i64, tpu.core_type = #tpu.core_type<tc>, window_params = [{transform_indices = @transform_0, window_bounds = array<i64: 16, 32>}, {transform_indices = @transform_1, window_bounds = array<i64: 32, 96>}, {transform_indices = @transform_2, window_bounds = array<i64: 1, 96>}, {transform_indices = @transform_3, window_bounds = array<i64: 16, 96>}]} {
    %c0_i32 = arith.constant 0 : i32
    %0 = arith.cmpi eq, %arg2, %c0_i32 : i32
    %1 = arith.extui %0 : i1 to i32
    %c0_i32_0 = arith.constant 0 : i32
    %2 = arith.cmpi ne, %1, %c0_i32_0 : i32
    scf.if %2 {
      %cst_10 = arith.constant 0.000000e+00 : f32
      %12 = vector.broadcast %cst_10 : f32 to vector<16x96xf32>
      %c0_11 = arith.constant 0 : index
      %c0_12 = arith.constant 0 : index
      %13 = vector.load %arg7[%c0_11, %c0_12] : memref<16x96xf32, #tpu.memory_space<vmem>>, vector<16x96xf32>
      tpu.vector_store %arg7[%c0_11, %c0_12], %12 {strides = array<i32>} : memref<16x96xf32, #tpu.memory_space<vmem>>, vector<16x96xf32>,
    } else {
    }
    %c0 = arith.constant 0 : index
    %c0_1 = arith.constant 0 : index
    %3 = vector.load %arg7[%c0, %c0_1] : memref<16x96xf32, #tpu.memory_space<vmem>>, vector<16x96xf32>
    %c0_2 = arith.constant 0 : index
    %c0_3 = arith.constant 0 : index
    %4 = vector.load %arg3[%c0_2, %c0_3] : memref<16x32xf32, #tpu.memory_space<vmem>>, vector<16x32xf32>
    %c0_4 = arith.constant 0 : index
    %c0_5 = arith.constant 0 : index
    %5 = vector.load %arg4[%c0_4, %c0_5] : memref<32x96xf32, #tpu.memory_space<vmem>>, vector<32x96xf32>
    %cst = arith.constant dense<0.000000e+00> : vector<16x96xf32>
    %6 = tpu.matmul %4, %5, %cst {dimension_numbers = #tpu.dot_dimension_numbers<[1], [0], [0], [1], [0, 0, 1, 1], [], []>} : vector<16x32xf32>, vector<32x96xf32>, vector<16x96xf32> -> vector<16x96xf32>
    %7 = arith.addf %3, %6 : vector<16x96xf32>
    %c0_6 = arith.constant 0 : index
    %c0_7 = arith.constant 0 : index
    %8 = vector.load %arg7[%c0_6, %c0_7] : memref<16x96xf32, #tpu.memory_space<vmem>>, vector<16x96xf32>
    tpu.vector_store %arg7[%c0_6, %c0_7], %7 {strides = array<i32>} : memref<16x96xf32, #tpu.memory_space<vmem>>, vector<16x96xf32>,
    %c0_i32_8 = arith.constant 0 : i32
    %9 = arith.cmpi eq, %arg2, %c0_i32_8 : i32
    %10 = arith.extui %9 : i1 to i32
    %c0_i32_9 = arith.constant 0 : i32
    %11 = arith.cmpi ne, %10, %c0_i32_9 : i32
    scf.if %11 {
      %c0_10 = arith.constant 0 : index
      %c0_11 = arith.constant 0 : index
      %12 = vector.load %arg7[%c0_10, %c0_11] : memref<16x96xf32, #tpu.memory_space<vmem>>, vector<16x96xf32>
      %c0_12 = arith.constant 0 : index
      %c0_13 = arith.constant 0 : index
      %13 = vector.load %arg5[%c0_12, %c0_13] : memref<1x96xf32, #tpu.memory_space<vmem>>, vector<1x96xf32>
      %14 = vector.broadcast %13 : vector<1x96xf32> to vector<16x96xf32>
      %15 = arith.addf %12, %14 : vector<16x96xf32>
      %c0_14 = arith.constant 0 : index
      %c0_15 = arith.constant 0 : index
      %16 = vector.load %arg6[%c0_14, %c0_15] : memref<16x96xf32, #tpu.memory_space<vmem>>, vector<16x96xf32>
      tpu.vector_store %arg6[%c0_14, %c0_15], %15 {strides = array<i32>} : memref<16x96xf32, #tpu.memory_space<vmem>>, vector<16x96xf32>,
    } else {
    }
    return
  }
  func.func @transform_0(%arg0: i32, %arg1: i32, %arg2: i32) -> (i32, i32) {
    %c0_i32 = arith.constant 0 : i32
    return %arg0, %arg2 : i32, i32
  }
  func.func @transform_1(%arg0: i32, %arg1: i32, %arg2: i32) -> (i32, i32) {
    %c0_i32 = arith.constant 0 : i32
    return %arg2, %arg1 : i32, i32
  }
  func.func @transform_2(%arg0: i32, %arg1: i32, %arg2: i32) -> (i32, i32) {
    %c0_i32 = arith.constant 0 : i32
    %c0_i32_0 = arith.constant 0 : i32
    return %c0_i32, %arg1 : i32, i32
  }
  func.func @transform_3(%arg0: i32, %arg1: i32, %arg2: i32) -> (i32, i32) {
    %c0_i32 = arith.constant 0 : i32
    return %arg0, %arg1 : i32, i32
  }
}

module attributes {stable_mosaic.version = 11 : i64} {
  func.func @_flash_attn_kernel(%arg0: i32, %arg1: i32, %arg2: i32, %arg3: memref<1x4x8x8xf32, #tpu.memory_space<vmem>>, %arg4: memref<1x4x8x8xf32, #tpu.memory_space<vmem>>, %arg5: memref<1x4x8x8xf32, #tpu.memory_space<vmem>>, %arg6: memref<1x4x8x8xf32, #tpu.memory_space<vmem>>, %arg7: memref<4x8x1xf32, #tpu.memory_space<vmem>>, %arg8: memref<4x8x1xf32, #tpu.memory_space<vmem>>, %arg9: memref<4x8x8xf32, #tpu.memory_space<vmem>>) attributes {dimension_semantics = [#tpu.dimension_semantics<parallel>, #tpu.dimension_semantics<parallel>, #tpu.dimension_semantics<arbitrary>], iteration_bounds = array<i64: 2, 1, 1>, scalar_prefetch = 0 : i64, scratch_operands = 3 : i64, tpu.core_type = #tpu.core_type<tc>, window_params = [{transform_indices = @transform_0, window_bounds = array<i64: 1, 4, 8, 8>}, {transform_indices = @transform_1, window_bounds = array<i64: 1, 4, 8, 8>}, {transform_indices = @transform_2, window_bounds = array<i64: 1, 4, 8, 8>}, {transform_indices = @transform_3, window_bounds = array<i64: 1, 4, 8, 8>}]} {
    %c0_i32 = arith.constant 0 : i32
    %0 = arith.cmpi eq, %arg2, %c0_i32 : i32
    %1 = arith.extui %0 : i1 to i32
    %c0_i32_0 = arith.constant 0 : i32
    %2 = arith.cmpi ne, %1, %c0_i32_0 : i32
    scf.if %2 {
      %cst = arith.constant -1.000000e+30 : f32
      %12 = vector.broadcast %cst : f32 to vector<4x8x1xf32>
      %c0 = arith.constant 0 : index
      %c0_5 = arith.constant 0 : index
      %c0_6 = arith.constant 0 : index
      %13 = vector.load %arg7[%c0, %c0_5, %c0_6] : memref<4x8x1xf32, #tpu.memory_space<vmem>>, vector<4x8x1xf32>
      tpu.vector_store %arg7[%c0, %c0_5, %c0_6], %12 {strides = array<i32>} : memref<4x8x1xf32, #tpu.memory_space<vmem>>, vector<4x8x1xf32>,
      %cst_7 = arith.constant 0.000000e+00 : f32
      %14 = vector.broadcast %cst_7 : f32 to vector<4x8x1xf32>
      %c0_8 = arith.constant 0 : index
      %c0_9 = arith.constant 0 : index
      %c0_10 = arith.constant 0 : index
      %15 = vector.load %arg8[%c0_8, %c0_9, %c0_10] : memref<4x8x1xf32, #tpu.memory_space<vmem>>, vector<4x8x1xf32>
      tpu.vector_store %arg8[%c0_8, %c0_9, %c0_10], %14 {strides = array<i32>} : memref<4x8x1xf32, #tpu.memory_space<vmem>>, vector<4x8x1xf32>,
      %cst_11 = arith.constant 0.000000e+00 : f32
      %16 = vector.broadcast %cst_11 : f32 to vector<4x8x8xf32>
      %c0_12 = arith.constant 0 : index
      %c0_13 = arith.constant 0 : index
      %c0_14 = arith.constant 0 : index
      %17 = vector.load %arg9[%c0_12, %c0_13, %c0_14] : memref<4x8x8xf32, #tpu.memory_space<vmem>>, vector<4x8x8xf32>
      tpu.vector_store %arg9[%c0_12, %c0_13, %c0_14], %16 {strides = array<i32>} : memref<4x8x8xf32, #tpu.memory_space<vmem>>, vector<4x8x8xf32>,
    } else {
    }
    %c8_i32 = arith.constant 8 : i32
    %3 = arith.muli %arg2, %c8_i32 : i32
    %c8_i32_1 = arith.constant 8 : i32
    %4 = arith.muli %arg1, %c8_i32_1 : i32
    %c7_i32 = arith.constant 7 : i32
    %5 = arith.addi %4, %c7_i32 : i32
    %6 = arith.cmpi sle, %3, %5 : i32
    %7 = arith.extui %6 : i1 to i32
    %c0_i32_2 = arith.constant 0 : i32
    %8 = arith.cmpi ne, %7, %c0_i32_2 : i32
    scf.if %8 {
      %c0 = arith.constant 0 : index
      %c0_5 = arith.constant 0 : index
      %c0_6 = arith.constant 0 : index
      %c0_7 = arith.constant 0 : index
      %12 = vector.load %arg3[%c0, %c0_5, %c0_6, %c0_7] : memref<1x4x8x8xf32, #tpu.memory_space<vmem>>, vector<1x4x8x8xf32>
      %13 = vector.shape_cast %12 : vector<1x4x8x8xf32> to vector<4x8x8xf32>
      %c0_8 = arith.constant 0 : index
      %c0_9 = arith.constant 0 : index
      %c0_10 = arith.constant 0 : index
      %c0_11 = arith.constant 0 : index
      %14 = vector.load %arg4[%c0_8, %c0_9, %c0_10, %c0_11] : memref<1x4x8x8xf32, #tpu.memory_space<vmem>>, vector<1x4x8x8xf32>
      %15 = vector.shape_cast %14 : vector<1x4x8x8xf32> to vector<4x8x8xf32>
      %c0_12 = arith.constant 0 : index
      %c0_13 = arith.constant 0 : index
      %c0_14 = arith.constant 0 : index
      %c0_15 = arith.constant 0 : index
      %16 = vector.load %arg5[%c0_12, %c0_13, %c0_14, %c0_15] : memref<1x4x8x8xf32, #tpu.memory_space<vmem>>, vector<1x4x8x8xf32>
      %17 = vector.shape_cast %16 : vector<1x4x8x8xf32> to vector<4x8x8xf32>
      "tpu.trace_start"() <{level = 10 : i32, message = "hqd,hkd->hqk"}> : () -> ()
      %cst = arith.constant dense<0.000000e+00> : vector<4x8x8xf32>
      %18 = tpu.matmul %13, %15, %cst {dimension_numbers = #tpu.dot_dimension_numbers<[2], [2], [1], [1], [0, 0, 0, 1, 1, 1], [0], [0]>} : vector<4x8x8xf32>, vector<4x8x8xf32>, vector<4x8x8xf32> -> vector<4x8x8xf32>
      "tpu.trace_stop"() : () -> ()
      %c8_i32_16 = arith.constant 8 : i32
      %19 = arith.muli %arg1, %c8_i32_16 : i32
      %20 = tpu.iota {dimensions = array<i32: 0>} : vector<8x8xi32>
      %21 = vector.broadcast %19 : i32 to vector<8x8xi32>
      %22 = arith.addi %21, %20 : vector<8x8xi32>
      %c8_i32_17 = arith.constant 8 : i32
      %23 = arith.muli %arg2, %c8_i32_17 : i32
      %24 = tpu.iota {dimensions = array<i32: 1>} : vector<8x8xi32>
      %25 = vector.broadcast %23 : i32 to vector<8x8xi32>
      %26 = arith.addi %25, %24 : vector<8x8xi32>
      %27 = arith.cmpi sgt, %26, %22 : vector<8x8xi32>
      %cst_18 = arith.constant -1.000000e+30 : f32
      %28 = vector.shape_cast %27 : vector<8x8xi1> to vector<1x8x8xi1>
      %29 = vector.broadcast %28 : vector<1x8x8xi1> to vector<4x8x8xi1>
      %30 = vector.broadcast %cst_18 : f32 to vector<4x8x8xf32>
      %31 = arith.select %29, %30, %18 : vector<4x8x8xi1>, vector<4x8x8xf32>
      %c0_19 = arith.constant 0 : index
      %c0_20 = arith.constant 0 : index
      %c0_21 = arith.constant 0 : index
      %32 = vector.load %arg7[%c0_19, %c0_20, %c0_21] : memref<4x8x1xf32, #tpu.memory_space<vmem>>, vector<4x8x1xf32>
      %cst_22 = arith.constant dense<0xFF800000> : vector<4x8xf32>
      %33 = vector.multi_reduction <maximumf>, %31, %cst_22 [2] : vector<4x8x8xf32> to vector<4x8xf32>
      %34 = vector.shape_cast %33 : vector<4x8xf32> to vector<4x8x1xf32>
      %35 = arith.maximumf %32, %34 : vector<4x8x1xf32>
      %36 = arith.subf %32, %35 : vector<4x8x1xf32>
      %37 = math.exp %36 : vector<4x8x1xf32>
      %38 = vector.broadcast %35 : vector<4x8x1xf32> to vector<4x8x8xf32>
      %39 = arith.subf %31, %38 : vector<4x8x8xf32>
      %40 = math.exp %39 : vector<4x8x8xf32>
      %c0_23 = arith.constant 0 : index
      %c0_24 = arith.constant 0 : index
      %c0_25 = arith.constant 0 : index
      %41 = vector.load %arg8[%c0_23, %c0_24, %c0_25] : memref<4x8x1xf32, #tpu.memory_space<vmem>>, vector<4x8x1xf32>
      %42 = arith.mulf %37, %41 : vector<4x8x1xf32>
      %cst_26 = arith.constant dense<0.000000e+00> : vector<4x8xf32>
      %43 = vector.multi_reduction <add>, %40, %cst_26 [2] : vector<4x8x8xf32> to vector<4x8xf32>
      %44 = vector.shape_cast %43 : vector<4x8xf32> to vector<4x8x1xf32>
      %45 = arith.addf %42, %44 : vector<4x8x1xf32>
      %c0_27 = arith.constant 0 : index
      %c0_28 = arith.constant 0 : index
      %c0_29 = arith.constant 0 : index
      %46 = vector.load %arg8[%c0_27, %c0_28, %c0_29] : memref<4x8x1xf32, #tpu.memory_space<vmem>>, vector<4x8x1xf32>
      tpu.vector_store %arg8[%c0_27, %c0_28, %c0_29], %45 {strides = array<i32>} : memref<4x8x1xf32, #tpu.memory_space<vmem>>, vector<4x8x1xf32>,
      %c0_30 = arith.constant 0 : index
      %c0_31 = arith.constant 0 : index
      %c0_32 = arith.constant 0 : index
      %47 = vector.load %arg9[%c0_30, %c0_31, %c0_32] : memref<4x8x8xf32, #tpu.memory_space<vmem>>, vector<4x8x8xf32>
      %48 = vector.broadcast %37 : vector<4x8x1xf32> to vector<4x8x8xf32>
      %49 = arith.mulf %48, %47 : vector<4x8x8xf32>
      "tpu.trace_start"() <{level = 10 : i32, message = "hqk,hkd->hqd"}> : () -> ()
      %cst_33 = arith.constant dense<0.000000e+00> : vector<4x8x8xf32>
      %50 = tpu.matmul %40, %17, %cst_33 {dimension_numbers = #tpu.dot_dimension_numbers<[2], [1], [1], [2], [0, 0, 0, 1, 1, 2], [0], [0]>} : vector<4x8x8xf32>, vector<4x8x8xf32>, vector<4x8x8xf32> -> vector<4x8x8xf32>
      "tpu.trace_stop"() : () -> ()
      %51 = arith.addf %49, %50 : vector<4x8x8xf32>
      %c0_34 = arith.constant 0 : index
      %c0_35 = arith.constant 0 : index
      %c0_36 = arith.constant 0 : index
      %52 = vector.load %arg9[%c0_34, %c0_35, %c0_36] : memref<4x8x8xf32, #tpu.memory_space<vmem>>, vector<4x8x8xf32>
      tpu.vector_store %arg9[%c0_34, %c0_35, %c0_36], %51 {strides = array<i32>} : memref<4x8x8xf32, #tpu.memory_space<vmem>>, vector<4x8x8xf32>,
      %c0_37 = arith.constant 0 : index
      %c0_38 = arith.constant 0 : index
      %c0_39 = arith.constant 0 : index
      %53 = vector.load %arg7[%c0_37, %c0_38, %c0_39] : memref<4x8x1xf32, #tpu.memory_space<vmem>>, vector<4x8x1xf32>
      tpu.vector_store %arg7[%c0_37, %c0_38, %c0_39], %35 {strides = array<i32>} : memref<4x8x1xf32, #tpu.memory_space<vmem>>, vector<4x8x1xf32>,
    } else {
    }
    %c0_i32_3 = arith.constant 0 : i32
    %9 = arith.cmpi eq, %arg2, %c0_i32_3 : i32
    %10 = arith.extui %9 : i1 to i32
    %c0_i32_4 = arith.constant 0 : i32
    %11 = arith.cmpi ne, %10, %c0_i32_4 : i32
    scf.if %11 {
      %c0 = arith.constant 0 : index
      %c0_5 = arith.constant 0 : index
      %c0_6 = arith.constant 0 : index
      %12 = vector.load %arg8[%c0, %c0_5, %c0_6] : memref<4x8x1xf32, #tpu.memory_space<vmem>>, vector<4x8x1xf32>
      %13 = tpu.reciprocal %12 {approx = true} : vector<4x8x1xf32> -> vector<4x8x1xf32>
      %c0_7 = arith.constant 0 : index
      %c0_8 = arith.constant 0 : index
      %c0_9 = arith.constant 0 : index
      %14 = vector.load %arg9[%c0_7, %c0_8, %c0_9] : memref<4x8x8xf32, #tpu.memory_space<vmem>>, vector<4x8x8xf32>
      %15 = vector.broadcast %13 : vector<4x8x1xf32> to vector<4x8x8xf32>
      %16 = arith.mulf %14, %15 : vector<4x8x8xf32>
      %c0_10 = arith.constant 0 : index
      %c0_11 = arith.constant 0 : index
      %c0_12 = arith.constant 0 : index
      %c0_13 = arith.constant 0 : index
      %17 = vector.load %arg6[%c0_10, %c0_11, %c0_12, %c0_13] : memref<1x4x8x8xf32, #tpu.memory_space<vmem>>, vector<1x4x8x8xf32>
      %18 = vector.shape_cast %17 : vector<1x4x8x8xf32> to vector<4x8x8xf32>
      %19 = vector.shape_cast %16 : vector<4x8x8xf32> to vector<1x4x8x8xf32>
      tpu.vector_store %arg6[%c0_10, %c0_11, %c0_12, %c0_13], %19 {strides = array<i32>} : memref<1x4x8x8xf32, #tpu.memory_space<vmem>>, vector<1x4x8x8xf32>,
    } else {
    }
    return
  }
  func.func @transform_0(%arg0: i32, %arg1: i32, %arg2: i32) -> (i32, i32, i32, i32) {
    %c0_i32 = arith.constant 0 : i32
    %c0_i32_0 = arith.constant 0 : i32
    %c0_i32_1 = arith.constant 0 : i32
    return %arg0, %c0_i32, %arg1, %c0_i32_0 : i32, i32, i32, i32
  }
  func.func @transform_1(%arg0: i32, %arg1: i32, %arg2: i32) -> (i32, i32, i32, i32) {
    %c0_i32 = arith.constant 0 : i32
    %c0_i32_0 = arith.constant 0 : i32
    %c0_i32_1 = arith.constant 0 : i32
    return %arg0, %c0_i32, %arg2, %c0_i32_0 : i32, i32, i32, i32
  }
  func.func @transform_2(%arg0: i32, %arg1: i32, %arg2: i32) -> (i32, i32, i32, i32) {
    %c0_i32 = arith.constant 0 : i32
    %c0_i32_0 = arith.constant 0 : i32
    %c0_i32_1 = arith.constant 0 : i32
    return %arg0, %c0_i32, %arg2, %c0_i32_0 : i32, i32, i32, i32
  }
  func.func @transform_3(%arg0: i32, %arg1: i32, %arg2: i32) -> (i32, i32, i32, i32) {
    %c0_i32 = arith.constant 0 : i32
    %c0_i32_0 = arith.constant 0 : i32
    %c0_i32_1 = arith.constant 0 : i32
    return %arg0, %c0_i32, %arg1, %c0_i32_0 : i32, i32, i32, i32
  }
}

module attributes {stable_mosaic.version = 11 : i64} {
  func.func @_linear_add_ln_kernel(%arg0: i32, %arg1: i32, %arg2: memref<16x32xf32, #tpu.memory_space<vmem>>, %arg3: memref<32x32xf32, #tpu.memory_space<vmem>>, %arg4: memref<1x32xf32, #tpu.memory_space<vmem>>, %arg5: memref<16x32xf32, #tpu.memory_space<vmem>>, %arg6: memref<1x32xf32, #tpu.memory_space<vmem>>, %arg7: memref<1x32xf32, #tpu.memory_space<vmem>>, %arg8: memref<16x32xf32, #tpu.memory_space<vmem>>, %arg9: memref<16x32xf32, #tpu.memory_space<vmem>>) attributes {dimension_semantics = [#tpu.dimension_semantics<parallel>, #tpu.dimension_semantics<arbitrary>], iteration_bounds = array<i64: 1, 1>, scalar_prefetch = 0 : i64, scratch_operands = 1 : i64, tpu.core_type = #tpu.core_type<tc>, window_params = [{transform_indices = @transform_0, window_bounds = array<i64: 16, 32>}, {transform_indices = @transform_1, window_bounds = array<i64: 32, 32>}, {pipeline_mode = #tpu.pipeline_mode<synchronous>, transform_indices = @transform_2, window_bounds = array<i64: 1, 32>}, {transform_indices = @transform_3, window_bounds = array<i64: 16, 32>}, {pipeline_mode = #tpu.pipeline_mode<synchronous>, transform_indices = @transform_4, window_bounds = array<i64: 1, 32>}, {pipeline_mode = #tpu.pipeline_mode<synchronous>, transform_indices = @transform_5, window_bounds = array<i64: 1, 32>}, {transform_indices = @transform_6, window_bounds = array<i64: 16, 32>}]} {
    %c0_i32 = arith.constant 0 : i32
    %0 = arith.cmpi eq, %arg1, %c0_i32 : i32
    %1 = arith.extui %0 : i1 to i32
    %c0_i32_0 = arith.constant 0 : i32
    %2 = arith.cmpi ne, %1, %c0_i32_0 : i32
    scf.if %2 {
      %cst_10 = arith.constant 0.000000e+00 : f32
      %12 = vector.broadcast %cst_10 : f32 to vector<16x32xf32>
      %c0_11 = arith.constant 0 : index
      %c0_12 = arith.constant 0 : index
      %13 = vector.load %arg9[%c0_11, %c0_12] : memref<16x32xf32, #tpu.memory_space<vmem>>, vector<16x32xf32>
      tpu.vector_store %arg9[%c0_11, %c0_12], %12 {strides = array<i32>} : memref<16x32xf32, #tpu.memory_space<vmem>>, vector<16x32xf32>,
    } else {
    }
    %c0 = arith.constant 0 : index
    %c0_1 = arith.constant 0 : index
    %3 = vector.load %arg9[%c0, %c0_1] : memref<16x32xf32, #tpu.memory_space<vmem>>, vector<16x32xf32>
    %c0_2 = arith.constant 0 : index
    %c0_3 = arith.constant 0 : index
    %4 = vector.load %arg2[%c0_2, %c0_3] : memref<16x32xf32, #tpu.memory_space<vmem>>, vector<16x32xf32>
    %c0_4 = arith.constant 0 : index
    %c0_5 = arith.constant 0 : index
    %5 = vector.load %arg3[%c0_4, %c0_5] : memref<32x32xf32, #tpu.memory_space<vmem>>, vector<32x32xf32>
    %cst = arith.constant dense<0.000000e+00> : vector<16x32xf32>
    %6 = tpu.matmul %4, %5, %cst {dimension_numbers = #tpu.dot_dimension_numbers<[1], [0], [0], [1], [0, 0, 1, 1], [], []>} : vector<16x32xf32>, vector<32x32xf32>, vector<16x32xf32> -> vector<16x32xf32>
    %7 = arith.addf %3, %6 : vector<16x32xf32>
    %c0_6 = arith.constant 0 : index
    %c0_7 = arith.constant 0 : index
    %8 = vector.load %arg9[%c0_6, %c0_7] : memref<16x32xf32, #tpu.memory_space<vmem>>, vector<16x32xf32>
    tpu.vector_store %arg9[%c0_6, %c0_7], %7 {strides = array<i32>} : memref<16x32xf32, #tpu.memory_space<vmem>>, vector<16x32xf32>,
    %c0_i32_8 = arith.constant 0 : i32
    %9 = arith.cmpi eq, %arg1, %c0_i32_8 : i32
    %10 = arith.extui %9 : i1 to i32
    %c0_i32_9 = arith.constant 0 : i32
    %11 = arith.cmpi ne, %10, %c0_i32_9 : i32
    scf.if %11 {
      %c0_10 = arith.constant 0 : index
      %c0_11 = arith.constant 0 : index
      %12 = vector.load %arg9[%c0_10, %c0_11] : memref<16x32xf32, #tpu.memory_space<vmem>>, vector<16x32xf32>
      %c0_12 = arith.constant 0 : index
      %c0_13 = arith.constant 0 : index
      %13 = vector.load %arg4[%c0_12, %c0_13] : memref<1x32xf32, #tpu.memory_space<vmem>>, vector<1x32xf32>
      %14 = vector.broadcast %13 : vector<1x32xf32> to vector<16x32xf32>
      %15 = arith.addf %12, %14 : vector<16x32xf32>
      %c0_14 = arith.constant 0 : index
      %c0_15 = arith.constant 0 : index
      %16 = vector.load %arg5[%c0_14, %c0_15] : memref<16x32xf32, #tpu.memory_space<vmem>>, vector<16x32xf32>
      %17 = arith.addf %15, %16 : vector<16x32xf32>
      %cst_16 = arith.constant dense<0.000000e+00> : vector<16xf32>
      %18 = vector.multi_reduction <add>, %17, %cst_16 [1] : vector<16x32xf32> to vector<16xf32>
      %19 = vector.shape_cast %18 : vector<16xf32> to vector<16x1xf32>
      %cst_17 = arith.constant 3.200000e+01 : f32
      %20 = vector.broadcast %cst_17 : f32 to vector<16x1xf32>
      %21 = arith.divf %19, %20 : vector<16x1xf32>
      %22 = vector.broadcast %21 : vector<16x1xf32> to vector<16x32xf32>
      %23 = arith.subf %17, %22 : vector<16x32xf32>
      %24 = arith.mulf %23, %23 : vector<16x32xf32>
      %cst_18 = arith.constant dense<0.000000e+00> : vector<16xf32>
      %25 = vector.multi_reduction <add>, %24, %cst_18 [1] : vector<16x32xf32> to vector<16xf32>
      %26 = vector.shape_cast %25 : vector<16xf32> to vector<16x1xf32>
      %cst_19 = arith.constant 3.200000e+01 : f32
      %27 = vector.broadcast %cst_19 : f32 to vector<16x1xf32>
      %28 = arith.divf %26, %27 : vector<16x1xf32>
      %29 = vector.broadcast %21 : vector<16x1xf32> to vector<16x32xf32>
      %30 = arith.subf %17, %29 : vector<16x32xf32>
      %cst_20 = arith.constant 9.99999974E-6 : f32
      %31 = vector.broadcast %cst_20 : f32 to vector<16x1xf32>
      %32 = arith.addf %28, %31 : vector<16x1xf32>
      %33 = math.rsqrt %32 : vector<16x1xf32>
      %34 = vector.broadcast %33 : vector<16x1xf32> to vector<16x32xf32>
      %35 = arith.mulf %30, %34 : vector<16x32xf32>
      %c0_21 = arith.constant 0 : index
      %c0_22 = arith.constant 0 : index
      %36 = vector.load %arg6[%c0_21, %c0_22] : memref<1x32xf32, #tpu.memory_space<vmem>>, vector<1x32xf32>
      %37 = vector.broadcast %36 : vector<1x32xf32> to vector<16x32xf32>
      %38 = arith.mulf %35, %37 : vector<16x32xf32>
      %c0_23 = arith.constant 0 : index
      %c0_24 = arith.constant 0 : index
      %39 = vector.load %arg7[%c0_23, %c0_24] : memref<1x32xf32, #tpu.memory_space<vmem>>, vector<1x32xf32>
      %40 = vector.broadcast %39 : vector<1x32xf32> to vector<16x32xf32>
      %41 = arith.addf %38, %40 : vector<16x32xf32>
      %c0_25 = arith.constant 0 : index
      %c0_26 = arith.constant 0 : index
      %42 = vector.load %arg8[%c0_25, %c0_26] : memref<16x32xf32, #tpu.memory_space<vmem>>, vector<16x32xf32>
      tpu.vector_store %arg8[%c0_25, %c0_26], %41 {strides = array<i32>} : memref<16x32xf32, #tpu.memory_space<vmem>>, vector<16x32xf32>,
    } else {
    }
    return
  }
  func.func @transform_0(%arg0: i32, %arg1: i32) -> (i32, i32) {
    %c0_i32 = arith.constant 0 : i32
    return %arg0, %arg1 : i32, i32
  }
  func.func @transform_1(%arg0: i32, %arg1: i32) -> (i32, i32) {
    %c0_i32 = arith.constant 0 : i32
    %c0_i32_0 = arith.constant 0 : i32
    return %arg1, %c0_i32 : i32, i32
  }
  func.func @transform_2(%arg0: i32, %arg1: i32) -> (i32, i32) {
    %c0_i32 = arith.constant 0 : i32
    %c0_i32_0 = arith.constant 0 : i32
    %c0_i32_1 = arith.constant 0 : i32
    return %c0_i32, %c0_i32_0 : i32, i32
  }
  func.func @transform_3(%arg0: i32, %arg1: i32) -> (i32, i32) {
    %c0_i32 = arith.constant 0 : i32
    %c0_i32_0 = arith.constant 0 : i32
    return %arg0, %c0_i32 : i32, i32
  }
  func.func @transform_4(%arg0: i32, %arg1: i32) -> (i32, i32) {
    %c0_i32 = arith.constant 0 : i32
    %c0_i32_0 = arith.constant 0 : i32
    %c0_i32_1 = arith.constant 0 : i32
    return %c0_i32, %c0_i32_0 : i32, i32
  }
  func.func @transform_5(%arg0: i32, %arg1: i32) -> (i32, i32) {
    %c0_i32 = arith.constant 0 : i32
    %c0_i32_0 = arith.constant 0 : i32
    %c0_i32_1 = arith.constant 0 : i32
    return %c0_i32, %c0_i32_0 : i32, i32
  }
  func.func @transform_6(%arg0: i32, %arg1: i32) -> (i32, i32) {
    %c0_i32 = arith.constant 0 : i32
    %c0_i32_0 = arith.constant 0 : i32
    return %arg0, %c0_i32 : i32, i32
  }
}

module attributes {stable_mosaic.version = 11 : i64} {
  func.func @_linear_kernel(%arg0: i32, %arg1: i32, %arg2: i32, %arg3: memref<16x32xf32, #tpu.memory_space<vmem>>, %arg4: memref<32x32xf32, #tpu.memory_space<vmem>>, %arg5: memref<1x32xf32, #tpu.memory_space<vmem>>, %arg6: memref<16x32xf32, #tpu.memory_space<vmem>>, %arg7: memref<16x32xf32, #tpu.memory_space<vmem>>) attributes {dimension_semantics = [#tpu.dimension_semantics<parallel>, #tpu.dimension_semantics<parallel>, #tpu.dimension_semantics<arbitrary>], iteration_bounds = array<i64: 1, 1, 1>, scalar_prefetch = 0 : i64, scratch_operands = 1 : i64, tpu.core_type = #tpu.core_type<tc>, window_params = [{transform_indices = @transform_0, window_bounds = array<i64: 16, 32>}, {transform_indices = @transform_1, window_bounds = array<i64: 32, 32>}, {transform_indices = @transform_2, window_bounds = array<i64: 1, 32>}, {transform_indices = @transform_3, window_bounds = array<i64: 16, 32>}]} {
    %c0_i32 = arith.constant 0 : i32
    %0 = arith.cmpi eq, %arg2, %c0_i32 : i32
    %1 = arith.extui %0 : i1 to i32
    %c0_i32_0 = arith.constant 0 : i32
    %2 = arith.cmpi ne, %1, %c0_i32_0 : i32
    scf.if %2 {
      %cst_10 = arith.constant 0.000000e+00 : f32
      %12 = vector.broadcast %cst_10 : f32 to vector<16x32xf32>
      %c0_11 = arith.constant 0 : index
      %c0_12 = arith.constant 0 : index
      %13 = vector.load %arg7[%c0_11, %c0_12] : memref<16x32xf32, #tpu.memory_space<vmem>>, vector<16x32xf32>
      tpu.vector_store %arg7[%c0_11, %c0_12], %12 {strides = array<i32>} : memref<16x32xf32, #tpu.memory_space<vmem>>, vector<16x32xf32>,
    } else {
    }
    %c0 = arith.constant 0 : index
    %c0_1 = arith.constant 0 : index
    %3 = vector.load %arg7[%c0, %c0_1] : memref<16x32xf32, #tpu.memory_space<vmem>>, vector<16x32xf32>
    %c0_2 = arith.constant 0 : index
    %c0_3 = arith.constant 0 : index
    %4 = vector.load %arg3[%c0_2, %c0_3] : memref<16x32xf32, #tpu.memory_space<vmem>>, vector<16x32xf32>
    %c0_4 = arith.constant 0 : index
    %c0_5 = arith.constant 0 : index
    %5 = vector.load %arg4[%c0_4, %c0_5] : memref<32x32xf32, #tpu.memory_space<vmem>>, vector<32x32xf32>
    %cst = arith.constant dense<0.000000e+00> : vector<16x32xf32>
    %6 = tpu.matmul %4, %5, %cst {dimension_numbers = #tpu.dot_dimension_numbers<[1], [0], [0], [1], [0, 0, 1, 1], [], []>} : vector<16x32xf32>, vector<32x32xf32>, vector<16x32xf32> -> vector<16x32xf32>
    %7 = arith.addf %3, %6 : vector<16x32xf32>
    %c0_6 = arith.constant 0 : index
    %c0_7 = arith.constant 0 : index
    %8 = vector.load %arg7[%c0_6, %c0_7] : memref<16x32xf32, #tpu.memory_space<vmem>>, vector<16x32xf32>
    tpu.vector_store %arg7[%c0_6, %c0_7], %7 {strides = array<i32>} : memref<16x32xf32, #tpu.memory_space<vmem>>, vector<16x32xf32>,
    %c0_i32_8 = arith.constant 0 : i32
    %9 = arith.cmpi eq, %arg2, %c0_i32_8 : i32
    %10 = arith.extui %9 : i1 to i32
    %c0_i32_9 = arith.constant 0 : i32
    %11 = arith.cmpi ne, %10, %c0_i32_9 : i32
    scf.if %11 {
      %c0_10 = arith.constant 0 : index
      %c0_11 = arith.constant 0 : index
      %12 = vector.load %arg7[%c0_10, %c0_11] : memref<16x32xf32, #tpu.memory_space<vmem>>, vector<16x32xf32>
      %c0_12 = arith.constant 0 : index
      %c0_13 = arith.constant 0 : index
      %13 = vector.load %arg5[%c0_12, %c0_13] : memref<1x32xf32, #tpu.memory_space<vmem>>, vector<1x32xf32>
      %14 = vector.broadcast %13 : vector<1x32xf32> to vector<16x32xf32>
      %15 = arith.addf %12, %14 : vector<16x32xf32>
      %c0_14 = arith.constant 0 : index
      %c0_15 = arith.constant 0 : index
      %16 = vector.load %arg6[%c0_14, %c0_15] : memref<16x32xf32, #tpu.memory_space<vmem>>, vector<16x32xf32>
      tpu.vector_store %arg6[%c0_14, %c0_15], %15 {strides = array<i32>} : memref<16x32xf32, #tpu.memory_space<vmem>>, vector<16x32xf32>,
    } else {
    }
    return
  }
  func.func @transform_0(%arg0: i32, %arg1: i32, %arg2: i32) -> (i32, i32) {
    %c0_i32 = arith.constant 0 : i32
    return %arg0, %arg2 : i32, i32
  }
  func.func @transform_1(%arg0: i32, %arg1: i32, %arg2: i32) -> (i32, i32) {
    %c0_i32 = arith.constant 0 : i32
    return %arg2, %arg1 : i32, i32
  }
  func.func @transform_2(%arg0: i32, %arg1: i32, %arg2: i32) -> (i32, i32) {
    %c0_i32 = arith.constant 0 : i32
    %c0_i32_0 = arith.constant 0 : i32
    return %c0_i32, %arg1 : i32, i32
  }
  func.func @transform_3(%arg0: i32, %arg1: i32, %arg2: i32) -> (i32, i32) {
    %c0_i32 = arith.constant 0 : i32
    return %arg0, %arg1 : i32, i32
  }
}

module attributes {stable_mosaic.version = 11 : i64} {
  func.func @_linear_kernel(%arg0: i32, %arg1: i32, %arg2: i32, %arg3: memref<16x32xf32, #tpu.memory_space<vmem>>, %arg4: memref<32x64xf32, #tpu.memory_space<vmem>>, %arg5: memref<1x64xf32, #tpu.memory_space<vmem>>, %arg6: memref<16x64xf32, #tpu.memory_space<vmem>>, %arg7: memref<16x64xf32, #tpu.memory_space<vmem>>) attributes {dimension_semantics = [#tpu.dimension_semantics<parallel>, #tpu.dimension_semantics<parallel>, #tpu.dimension_semantics<arbitrary>], iteration_bounds = array<i64: 1, 1, 1>, scalar_prefetch = 0 : i64, scratch_operands = 1 : i64, tpu.core_type = #tpu.core_type<tc>, window_params = [{transform_indices = @transform_0, window_bounds = array<i64: 16, 32>}, {transform_indices = @transform_1, window_bounds = array<i64: 32, 64>}, {transform_indices = @transform_2, window_bounds = array<i64: 1, 64>}, {transform_indices = @transform_3, window_bounds = array<i64: 16, 64>}]} {
    %c0_i32 = arith.constant 0 : i32
    %0 = arith.cmpi eq, %arg2, %c0_i32 : i32
    %1 = arith.extui %0 : i1 to i32
    %c0_i32_0 = arith.constant 0 : i32
    %2 = arith.cmpi ne, %1, %c0_i32_0 : i32
    scf.if %2 {
      %cst_10 = arith.constant 0.000000e+00 : f32
      %12 = vector.broadcast %cst_10 : f32 to vector<16x64xf32>
      %c0_11 = arith.constant 0 : index
      %c0_12 = arith.constant 0 : index
      %13 = vector.load %arg7[%c0_11, %c0_12] : memref<16x64xf32, #tpu.memory_space<vmem>>, vector<16x64xf32>
      tpu.vector_store %arg7[%c0_11, %c0_12], %12 {strides = array<i32>} : memref<16x64xf32, #tpu.memory_space<vmem>>, vector<16x64xf32>,
    } else {
    }
    %c0 = arith.constant 0 : index
    %c0_1 = arith.constant 0 : index
    %3 = vector.load %arg7[%c0, %c0_1] : memref<16x64xf32, #tpu.memory_space<vmem>>, vector<16x64xf32>
    %c0_2 = arith.constant 0 : index
    %c0_3 = arith.constant 0 : index
    %4 = vector.load %arg3[%c0_2, %c0_3] : memref<16x32xf32, #tpu.memory_space<vmem>>, vector<16x32xf32>
    %c0_4 = arith.constant 0 : index
    %c0_5 = arith.constant 0 : index
    %5 = vector.load %arg4[%c0_4, %c0_5] : memref<32x64xf32, #tpu.memory_space<vmem>>, vector<32x64xf32>
    %cst = arith.constant dense<0.000000e+00> : vector<16x64xf32>
    %6 = tpu.matmul %4, %5, %cst {dimension_numbers = #tpu.dot_dimension_numbers<[1], [0], [0], [1], [0, 0, 1, 1], [], []>} : vector<16x32xf32>, vector<32x64xf32>, vector<16x64xf32> -> vector<16x64xf32>
    %7 = arith.addf %3, %6 : vector<16x64xf32>
    %c0_6 = arith.constant 0 : index
    %c0_7 = arith.constant 0 : index
    %8 = vector.load %arg7[%c0_6, %c0_7] : memref<16x64xf32, #tpu.memory_space<vmem>>, vector<16x64xf32>
    tpu.vector_store %arg7[%c0_6, %c0_7], %7 {strides = array<i32>} : memref<16x64xf32, #tpu.memory_space<vmem>>, vector<16x64xf32>,
    %c0_i32_8 = arith.constant 0 : i32
    %9 = arith.cmpi eq, %arg2, %c0_i32_8 : i32
    %10 = arith.extui %9 : i1 to i32
    %c0_i32_9 = arith.constant 0 : i32
    %11 = arith.cmpi ne, %10, %c0_i32_9 : i32
    scf.if %11 {
      %c0_10 = arith.constant 0 : index
      %c0_11 = arith.constant 0 : index
      %12 = vector.load %arg7[%c0_10, %c0_11] : memref<16x64xf32, #tpu.memory_space<vmem>>, vector<16x64xf32>
      %c0_12 = arith.constant 0 : index
      %c0_13 = arith.constant 0 : index
      %13 = vector.load %arg5[%c0_12, %c0_13] : memref<1x64xf32, #tpu.memory_space<vmem>>, vector<1x64xf32>
      %14 = vector.broadcast %13 : vector<1x64xf32> to vector<16x64xf32>
      %15 = arith.addf %12, %14 : vector<16x64xf32>
      %c0_14 = arith.constant 0 : index
      %c0_15 = arith.constant 0 : index
      %16 = vector.load %arg6[%c0_14, %c0_15] : memref<16x64xf32, #tpu.memory_space<vmem>>, vector<16x64xf32>
      tpu.vector_store %arg6[%c0_14, %c0_15], %15 {strides = array<i32>} : memref<16x64xf32, #tpu.memory_space<vmem>>, vector<16x64xf32>,
    } else {
    }
    return
  }
  func.func @transform_0(%arg0: i32, %arg1: i32, %arg2: i32) -> (i32, i32) {
    %c0_i32 = arith.constant 0 : i32
    return %arg0, %arg2 : i32, i32
  }
  func.func @transform_1(%arg0: i32, %arg1: i32, %arg2: i32) -> (i32, i32) {
    %c0_i32 = arith.constant 0 : i32
    return %arg2, %arg1 : i32, i32
  }
  func.func @transform_2(%arg0: i32, %arg1: i32, %arg2: i32) -> (i32, i32) {
    %c0_i32 = arith.constant 0 : i32
    %c0_i32_0 = arith.constant 0 : i32
    return %c0_i32, %arg1 : i32, i32
  }
  func.func @transform_3(%arg0: i32, %arg1: i32, %arg2: i32) -> (i32, i32) {
    %c0_i32 = arith.constant 0 : i32
    return %arg0, %arg1 : i32, i32
  }
}

module attributes {stable_mosaic.version = 11 : i64} {
  func.func @_linear_kernel(%arg0: i32, %arg1: i32, %arg2: i32, %arg3: memref<16x32xf32, #tpu.memory_space<vmem>>, %arg4: memref<32x128xf32, #tpu.memory_space<vmem>>, %arg5: memref<1x128xf32, #tpu.memory_space<vmem>>, %arg6: memref<16x128xf32, #tpu.memory_space<vmem>>, %arg7: memref<16x128xf32, #tpu.memory_space<vmem>>) attributes {dimension_semantics = [#tpu.dimension_semantics<parallel>, #tpu.dimension_semantics<parallel>, #tpu.dimension_semantics<arbitrary>], iteration_bounds = array<i64: 1, 1, 1>, scalar_prefetch = 0 : i64, scratch_operands = 1 : i64, tpu.core_type = #tpu.core_type<tc>, window_params = [{transform_indices = @transform_0, window_bounds = array<i64: 16, 32>}, {transform_indices = @transform_1, window_bounds = array<i64: 32, 128>}, {transform_indices = @transform_2, window_bounds = array<i64: 1, 128>}, {transform_indices = @transform_3, window_bounds = array<i64: 16, 128>}]} {
    %c0_i32 = arith.constant 0 : i32
    %0 = arith.cmpi eq, %arg2, %c0_i32 : i32
    %1 = arith.extui %0 : i1 to i32
    %c0_i32_0 = arith.constant 0 : i32
    %2 = arith.cmpi ne, %1, %c0_i32_0 : i32
    scf.if %2 {
      %cst_10 = arith.constant 0.000000e+00 : f32
      %12 = vector.broadcast %cst_10 : f32 to vector<16x128xf32>
      %c0_11 = arith.constant 0 : index
      %c0_12 = arith.constant 0 : index
      %13 = vector.load %arg7[%c0_11, %c0_12] : memref<16x128xf32, #tpu.memory_space<vmem>>, vector<16x128xf32>
      tpu.vector_store %arg7[%c0_11, %c0_12], %12 {strides = array<i32>} : memref<16x128xf32, #tpu.memory_space<vmem>>, vector<16x128xf32>,
    } else {
    }
    %c0 = arith.constant 0 : index
    %c0_1 = arith.constant 0 : index
    %3 = vector.load %arg7[%c0, %c0_1] : memref<16x128xf32, #tpu.memory_space<vmem>>, vector<16x128xf32>
    %c0_2 = arith.constant 0 : index
    %c0_3 = arith.constant 0 : index
    %4 = vector.load %arg3[%c0_2, %c0_3] : memref<16x32xf32, #tpu.memory_space<vmem>>, vector<16x32xf32>
    %c0_4 = arith.constant 0 : index
    %c0_5 = arith.constant 0 : index
    %5 = vector.load %arg4[%c0_4, %c0_5] : memref<32x128xf32, #tpu.memory_space<vmem>>, vector<32x128xf32>
    %cst = arith.constant dense<0.000000e+00> : vector<16x128xf32>
    %6 = tpu.matmul %4, %5, %cst {dimension_numbers = #tpu.dot_dimension_numbers<[1], [0], [0], [1], [0, 0, 1, 1], [], []>} : vector<16x32xf32>, vector<32x128xf32>, vector<16x128xf32> -> vector<16x128xf32>
    %7 = arith.addf %3, %6 : vector<16x128xf32>
    %c0_6 = arith.constant 0 : index
    %c0_7 = arith.constant 0 : index
    %8 = vector.load %arg7[%c0_6, %c0_7] : memref<16x128xf32, #tpu.memory_space<vmem>>, vector<16x128xf32>
    tpu.vector_store %arg7[%c0_6, %c0_7], %7 {strides = array<i32>} : memref<16x128xf32, #tpu.memory_space<vmem>>, vector<16x128xf32>,
    %c0_i32_8 = arith.constant 0 : i32
    %9 = arith.cmpi eq, %arg2, %c0_i32_8 : i32
    %10 = arith.extui %9 : i1 to i32
    %c0_i32_9 = arith.constant 0 : i32
    %11 = arith.cmpi ne, %10, %c0_i32_9 : i32
    scf.if %11 {
      %c0_10 = arith.constant 0 : index
      %c0_11 = arith.constant 0 : index
      %12 = vector.load %arg7[%c0_10, %c0_11] : memref<16x128xf32, #tpu.memory_space<vmem>>, vector<16x128xf32>
      %c0_12 = arith.constant 0 : index
      %c0_13 = arith.constant 0 : index
      %13 = vector.load %arg5[%c0_12, %c0_13] : memref<1x128xf32, #tpu.memory_space<vmem>>, vector<1x128xf32>
      %14 = vector.broadcast %13 : vector<1x128xf32> to vector<16x128xf32>
      %15 = arith.addf %12, %14 : vector<16x128xf32>
      %cst_14 = arith.constant 5.000000e-01 : f32
      %16 = vector.broadcast %cst_14 : f32 to vector<16x128xf32>
      %17 = arith.mulf %16, %15 : vector<16x128xf32>
      %cst_15 = arith.constant 4.471500e-02 : f32
      %18 = vector.broadcast %cst_15 : f32 to vector<16x128xf32>
      %19 = arith.mulf %18, %15 : vector<16x128xf32>
      %20 = arith.mulf %19, %15 : vector<16x128xf32>
      %21 = arith.mulf %20, %15 : vector<16x128xf32>
      %22 = arith.addf %15, %21 : vector<16x128xf32>
      %cst_16 = arith.constant 0.797884583 : f32
      %23 = vector.broadcast %cst_16 : f32 to vector<16x128xf32>
      %24 = arith.mulf %23, %22 : vector<16x128xf32>
      %25 = math.tanh %24 : vector<16x128xf32>
      %cst_17 = arith.constant 1.000000e+00 : f32
      %26 = vector.broadcast %cst_17 : f32 to vector<16x128xf32>
      %27 = arith.addf %26, %25 : vector<16x128xf32>
      %28 = arith.mulf %17, %27 : vector<16x128xf32>
      %c0_18 = arith.constant 0 : index
      %c0_19 = arith.constant 0 : index
      %29 = vector.load %arg6[%c0_18, %c0_19] : memref<16x128xf32, #tpu.memory_space<vmem>>, vector<16x128xf32>
      tpu.vector_store %arg6[%c0_18, %c0_19], %28 {strides = array<i32>} : memref<16x128xf32, #tpu.memory_space<vmem>>, vector<16x128xf32>,
    } else {
    }
    return
  }
  func.func @transform_0(%arg0: i32, %arg1: i32, %arg2: i32) -> (i32, i32) {
    %c0_i32 = arith.constant 0 : i32
    return %arg0, %arg2 : i32, i32
  }
  func.func @transform_1(%arg0: i32, %arg1: i32, %arg2: i32) -> (i32, i32) {
    %c0_i32 = arith.constant 0 : i32
    return %arg2, %arg1 : i32, i32
  }
  func.func @transform_2(%arg0: i32, %arg1: i32, %arg2: i32) -> (i32, i32) {
    %c0_i32 = arith.constant 0 : i32
    %c0_i32_0 = arith.constant 0 : i32
    return %c0_i32, %arg1 : i32, i32
  }
  func.func @transform_3(%arg0: i32, %arg1: i32, %arg2: i32) -> (i32, i32) {
    %c0_i32 = arith.constant 0 : i32
    return %arg0, %arg1 : i32, i32
  }
}

module attributes {stable_mosaic.version = 11 : i64} {
  func.func @_flash_attn_kernel(%arg0: i32, %arg1: i32, %arg2: i32, %arg3: memref<1x4x8x8xf32, #tpu.memory_space<vmem>>, %arg4: memref<1x4x8x8xf32, #tpu.memory_space<vmem>>, %arg5: memref<1x4x8x8xf32, #tpu.memory_space<vmem>>, %arg6: memref<1x4x8x8xf32, #tpu.memory_space<vmem>>, %arg7: memref<4x8x1xf32, #tpu.memory_space<vmem>>, %arg8: memref<4x8x1xf32, #tpu.memory_space<vmem>>, %arg9: memref<4x8x8xf32, #tpu.memory_space<vmem>>) attributes {dimension_semantics = [#tpu.dimension_semantics<parallel>, #tpu.dimension_semantics<parallel>, #tpu.dimension_semantics<arbitrary>], iteration_bounds = array<i64: 2, 1, 1>, scalar_prefetch = 0 : i64, scratch_operands = 3 : i64, tpu.core_type = #tpu.core_type<tc>, window_params = [{transform_indices = @transform_0, window_bounds = array<i64: 1, 4, 8, 8>}, {transform_indices = @transform_1, window_bounds = array<i64: 1, 4, 8, 8>}, {transform_indices = @transform_2, window_bounds = array<i64: 1, 4, 8, 8>}, {transform_indices = @transform_3, window_bounds = array<i64: 1, 4, 8, 8>}]} {
    %c0_i32 = arith.constant 0 : i32
    %0 = arith.cmpi eq, %arg2, %c0_i32 : i32
    %1 = arith.extui %0 : i1 to i32
    %c0_i32_0 = arith.constant 0 : i32
    %2 = arith.cmpi ne, %1, %c0_i32_0 : i32
    scf.if %2 {
      %cst_35 = arith.constant -1.000000e+30 : f32
      %35 = vector.broadcast %cst_35 : f32 to vector<4x8x1xf32>
      %c0_36 = arith.constant 0 : index
      %c0_37 = arith.constant 0 : index
      %c0_38 = arith.constant 0 : index
      %36 = vector.load %arg7[%c0_36, %c0_37, %c0_38] : memref<4x8x1xf32, #tpu.memory_space<vmem>>, vector<4x8x1xf32>
      tpu.vector_store %arg7[%c0_36, %c0_37, %c0_38], %35 {strides = array<i32>} : memref<4x8x1xf32, #tpu.memory_space<vmem>>, vector<4x8x1xf32>,
      %cst_39 = arith.constant 0.000000e+00 : f32
      %37 = vector.broadcast %cst_39 : f32 to vector<4x8x1xf32>
      %c0_40 = arith.constant 0 : index
      %c0_41 = arith.constant 0 : index
      %c0_42 = arith.constant 0 : index
      %38 = vector.load %arg8[%c0_40, %c0_41, %c0_42] : memref<4x8x1xf32, #tpu.memory_space<vmem>>, vector<4x8x1xf32>
      tpu.vector_store %arg8[%c0_40, %c0_41, %c0_42], %37 {strides = array<i32>} : memref<4x8x1xf32, #tpu.memory_space<vmem>>, vector<4x8x1xf32>,
      %cst_43 = arith.constant 0.000000e+00 : f32
      %39 = vector.broadcast %cst_43 : f32 to vector<4x8x8xf32>
      %c0_44 = arith.constant 0 : index
      %c0_45 = arith.constant 0 : index
      %c0_46 = arith.constant 0 : index
      %40 = vector.load %arg9[%c0_44, %c0_45, %c0_46] : memref<4x8x8xf32, #tpu.memory_space<vmem>>, vector<4x8x8xf32>
      tpu.vector_store %arg9[%c0_44, %c0_45, %c0_46], %39 {strides = array<i32>} : memref<4x8x8xf32, #tpu.memory_space<vmem>>, vector<4x8x8xf32>,
    } else {
    }
    %c0 = arith.constant 0 : index
    %c0_1 = arith.constant 0 : index
    %c0_2 = arith.constant 0 : index
    %c0_3 = arith.constant 0 : index
    %3 = vector.load %arg3[%c0, %c0_1, %c0_2, %c0_3] : memref<1x4x8x8xf32, #tpu.memory_space<vmem>>, vector<1x4x8x8xf32>
    %4 = vector.shape_cast %3 : vector<1x4x8x8xf32> to vector<4x8x8xf32>
    %c0_4 = arith.constant 0 : index
    %c0_5 = arith.constant 0 : index
    %c0_6 = arith.constant 0 : index
    %c0_7 = arith.constant 0 : index
    %5 = vector.load %arg4[%c0_4, %c0_5, %c0_6, %c0_7] : memref<1x4x8x8xf32, #tpu.memory_space<vmem>>, vector<1x4x8x8xf32>
    %6 = vector.shape_cast %5 : vector<1x4x8x8xf32> to vector<4x8x8xf32>
    %c0_8 = arith.constant 0 : index
    %c0_9 = arith.constant 0 : index
    %c0_10 = arith.constant 0 : index
    %c0_11 = arith.constant 0 : index
    %7 = vector.load %arg5[%c0_8, %c0_9, %c0_10, %c0_11] : memref<1x4x8x8xf32, #tpu.memory_space<vmem>>, vector<1x4x8x8xf32>
    %8 = vector.shape_cast %7 : vector<1x4x8x8xf32> to vector<4x8x8xf32>
    "tpu.trace_start"() <{level = 10 : i32, message = "hqd,hkd->hqk"}> : () -> ()
    %cst = arith.constant dense<0.000000e+00> : vector<4x8x8xf32>
    %9 = tpu.matmul %4, %6, %cst {dimension_numbers = #tpu.dot_dimension_numbers<[2], [2], [1], [1], [0, 0, 0, 1, 1, 1], [0], [0]>} : vector<4x8x8xf32>, vector<4x8x8xf32>, vector<4x8x8xf32> -> vector<4x8x8xf32>
    "tpu.trace_stop"() : () -> ()
    %c0_12 = arith.constant 0 : index
    %c0_13 = arith.constant 0 : index
    %c0_14 = arith.constant 0 : index
    %10 = vector.load %arg7[%c0_12, %c0_13, %c0_14] : memref<4x8x1xf32, #tpu.memory_space<vmem>>, vector<4x8x1xf32>
    %cst_15 = arith.constant dense<0xFF800000> : vector<4x8xf32>
    %11 = vector.multi_reduction <maximumf>, %9, %cst_15 [2] : vector<4x8x8xf32> to vector<4x8xf32>
    %12 = vector.shape_cast %11 : vector<4x8xf32> to vector<4x8x1xf32>
    %13 = arith.maximumf %10, %12 : vector<4x8x1xf32>
    %14 = arith.subf %10, %13 : vector<4x8x1xf32>
    %15 = math.exp %14 : vector<4x8x1xf32>
    %16 = vector.broadcast %13 : vector<4x8x1xf32> to vector<4x8x8xf32>
    %17 = arith.subf %9, %16 : vector<4x8x8xf32>
    %18 = math.exp %17 : vector<4x8x8xf32>
    %c0_16 = arith.constant 0 : index
    %c0_17 = arith.constant 0 : index
    %c0_18 = arith.constant 0 : index
    %19 = vector.load %arg8[%c0_16, %c0_17, %c0_18] : memref<4x8x1xf32, #tpu.memory_space<vmem>>, vector<4x8x1xf32>
    %20 = arith.mulf %15, %19 : vector<4x8x1xf32>
    %cst_19 = arith.constant dense<0.000000e+00> : vector<4x8xf32>
    %21 = vector.multi_reduction <add>, %18, %cst_19 [2] : vector<4x8x8xf32> to vector<4x8xf32>
    %22 = vector.shape_cast %21 : vector<4x8xf32> to vector<4x8x1xf32>
    %23 = arith.addf %20, %22 : vector<4x8x1xf32>
    %c0_20 = arith.constant 0 : index
    %c0_21 = arith.constant 0 : index
    %c0_22 = arith.constant 0 : index
    %24 = vector.load %arg8[%c0_20, %c0_21, %c0_22] : memref<4x8x1xf32, #tpu.memory_space<vmem>>, vector<4x8x1xf32>
    tpu.vector_store %arg8[%c0_20, %c0_21, %c0_22], %23 {strides = array<i32>} : memref<4x8x1xf32, #tpu.memory_space<vmem>>, vector<4x8x1xf32>,
    %c0_23 = arith.constant 0 : index
    %c0_24 = arith.constant 0 : index
    %c0_25 = arith.constant 0 : index
    %25 = vector.load %arg9[%c0_23, %c0_24, %c0_25] : memref<4x8x8xf32, #tpu.memory_space<vmem>>, vector<4x8x8xf32>
    %26 = vector.broadcast %15 : vector<4x8x1xf32> to vector<4x8x8xf32>
    %27 = arith.mulf %26, %25 : vector<4x8x8xf32>
    "tpu.trace_start"() <{level = 10 : i32, message = "hqk,hkd->hqd"}> : () -> ()
    %cst_26 = arith.constant dense<0.000000e+00> : vector<4x8x8xf32>
    %28 = tpu.matmul %18, %8, %cst_26 {dimension_numbers = #tpu.dot_dimension_numbers<[2], [1], [1], [2], [0, 0, 0, 1, 1, 2], [0], [0]>} : vector<4x8x8xf32>, vector<4x8x8xf32>, vector<4x8x8xf32> -> vector<4x8x8xf32>
    "tpu.trace_stop"() : () -> ()
    %29 = arith.addf %27, %28 : vector<4x8x8xf32>
    %c0_27 = arith.constant 0 : index
    %c0_28 = arith.constant 0 : index
    %c0_29 = arith.constant 0 : index
    %30 = vector.load %arg9[%c0_27, %c0_28, %c0_29] : memref<4x8x8xf32, #tpu.memory_space<vmem>>, vector<4x8x8xf32>
    tpu.vector_store %arg9[%c0_27, %c0_28, %c0_29], %29 {strides = array<i32>} : memref<4x8x8xf32, #tpu.memory_space<vmem>>, vector<4x8x8xf32>,
    %c0_30 = arith.constant 0 : index
    %c0_31 = arith.constant 0 : index
    %c0_32 = arith.constant 0 : index
    %31 = vector.load %arg7[%c0_30, %c0_31, %c0_32] : memref<4x8x1xf32, #tpu.memory_space<vmem>>, vector<4x8x1xf32>
    tpu.vector_store %arg7[%c0_30, %c0_31, %c0_32], %13 {strides = array<i32>} : memref<4x8x1xf32, #tpu.memory_space<vmem>>, vector<4x8x1xf32>,
    %c0_i32_33 = arith.constant 0 : i32
    %32 = arith.cmpi eq, %arg2, %c0_i32_33 : i32
    %33 = arith.extui %32 : i1 to i32
    %c0_i32_34 = arith.constant 0 : i32
    %34 = arith.cmpi ne, %33, %c0_i32_34 : i32
    scf.if %34 {
      %c0_35 = arith.constant 0 : index
      %c0_36 = arith.constant 0 : index
      %c0_37 = arith.constant 0 : index
      %35 = vector.load %arg8[%c0_35, %c0_36, %c0_37] : memref<4x8x1xf32, #tpu.memory_space<vmem>>, vector<4x8x1xf32>
      %36 = tpu.reciprocal %35 {approx = true} : vector<4x8x1xf32> -> vector<4x8x1xf32>
      %c0_38 = arith.constant 0 : index
      %c0_39 = arith.constant 0 : index
      %c0_40 = arith.constant 0 : index
      %37 = vector.load %arg9[%c0_38, %c0_39, %c0_40] : memref<4x8x8xf32, #tpu.memory_space<vmem>>, vector<4x8x8xf32>
      %38 = vector.broadcast %36 : vector<4x8x1xf32> to vector<4x8x8xf32>
      %39 = arith.mulf %37, %38 : vector<4x8x8xf32>
      %c0_41 = arith.constant 0 : index
      %c0_42 = arith.constant 0 : index
      %c0_43 = arith.constant 0 : index
      %c0_44 = arith.constant 0 : index
      %40 = vector.load %arg6[%c0_41, %c0_42, %c0_43, %c0_44] : memref<1x4x8x8xf32, #tpu.memory_space<vmem>>, vector<1x4x8x8xf32>
      %41 = vector.shape_cast %40 : vector<1x4x8x8xf32> to vector<4x8x8xf32>
      %42 = vector.shape_cast %39 : vector<4x8x8xf32> to vector<1x4x8x8xf32>
      tpu.vector_store %arg6[%c0_41, %c0_42, %c0_43, %c0_44], %42 {strides = array<i32>} : memref<1x4x8x8xf32, #tpu.memory_space<vmem>>, vector<1x4x8x8xf32>,
    } else {
    }
    return
  }
  func.func @transform_0(%arg0: i32, %arg1: i32, %arg2: i32) -> (i32, i32, i32, i32) {
    %c0_i32 = arith.constant 0 : i32
    %c0_i32_0 = arith.constant 0 : i32
    %c0_i32_1 = arith.constant 0 : i32
    return %arg0, %c0_i32, %arg1, %c0_i32_0 : i32, i32, i32, i32
  }
  func.func @transform_1(%arg0: i32, %arg1: i32, %arg2: i32) -> (i32, i32, i32, i32) {
    %c0_i32 = arith.constant 0 : i32
    %c0_i32_0 = arith.constant 0 : i32
    %c0_i32_1 = arith.constant 0 : i32
    return %arg0, %c0_i32, %arg2, %c0_i32_0 : i32, i32, i32, i32
  }
  func.func @transform_2(%arg0: i32, %arg1: i32, %arg2: i32) -> (i32, i32, i32, i32) {
    %c0_i32 = arith.constant 0 : i32
    %c0_i32_0 = arith.constant 0 : i32
    %c0_i32_1 = arith.constant 0 : i32
    return %arg0, %c0_i32, %arg2, %c0_i32_0 : i32, i32, i32, i32
  }
  func.func @transform_3(%arg0: i32, %arg1: i32, %arg2: i32) -> (i32, i32, i32, i32) {
    %c0_i32 = arith.constant 0 : i32
    %c0_i32_0 = arith.constant 0 : i32
    %c0_i32_1 = arith.constant 0 : i32
    return %arg0, %c0_i32, %arg1, %c0_i32_0 : i32, i32, i32, i32
  }
}

module attributes {stable_mosaic.version = 11 : i64} {
  func.func @_linear_add_ln_kernel(%arg0: i32, %arg1: i32, %arg2: memref<16x128xf32, #tpu.memory_space<vmem>>, %arg3: memref<128x32xf32, #tpu.memory_space<vmem>>, %arg4: memref<1x32xf32, #tpu.memory_space<vmem>>, %arg5: memref<16x32xf32, #tpu.memory_space<vmem>>, %arg6: memref<1x32xf32, #tpu.memory_space<vmem>>, %arg7: memref<1x32xf32, #tpu.memory_space<vmem>>, %arg8: memref<16x32xf32, #tpu.memory_space<vmem>>, %arg9: memref<16x32xf32, #tpu.memory_space<vmem>>) attributes {dimension_semantics = [#tpu.dimension_semantics<parallel>, #tpu.dimension_semantics<arbitrary>], iteration_bounds = array<i64: 1, 1>, scalar_prefetch = 0 : i64, scratch_operands = 1 : i64, tpu.core_type = #tpu.core_type<tc>, window_params = [{transform_indices = @transform_0, window_bounds = array<i64: 16, 128>}, {transform_indices = @transform_1, window_bounds = array<i64: 128, 32>}, {pipeline_mode = #tpu.pipeline_mode<synchronous>, transform_indices = @transform_2, window_bounds = array<i64: 1, 32>}, {transform_indices = @transform_3, window_bounds = array<i64: 16, 32>}, {pipeline_mode = #tpu.pipeline_mode<synchronous>, transform_indices = @transform_4, window_bounds = array<i64: 1, 32>}, {pipeline_mode = #tpu.pipeline_mode<synchronous>, transform_indices = @transform_5, window_bounds = array<i64: 1, 32>}, {transform_indices = @transform_6, window_bounds = array<i64: 16, 32>}]} {
    %c0_i32 = arith.constant 0 : i32
    %0 = arith.cmpi eq, %arg1, %c0_i32 : i32
    %1 = arith.extui %0 : i1 to i32
    %c0_i32_0 = arith.constant 0 : i32
    %2 = arith.cmpi ne, %1, %c0_i32_0 : i32
    scf.if %2 {
      %cst_10 = arith.constant 0.000000e+00 : f32
      %12 = vector.broadcast %cst_10 : f32 to vector<16x32xf32>
      %c0_11 = arith.constant 0 : index
      %c0_12 = arith.constant 0 : index
      %13 = vector.load %arg9[%c0_11, %c0_12] : memref<16x32xf32, #tpu.memory_space<vmem>>, vector<16x32xf32>
      tpu.vector_store %arg9[%c0_11, %c0_12], %12 {strides = array<i32>} : memref<16x32xf32, #tpu.memory_space<vmem>>, vector<16x32xf32>,
    } else {
    }
    %c0 = arith.constant 0 : index
    %c0_1 = arith.constant 0 : index
    %3 = vector.load %arg9[%c0, %c0_1] : memref<16x32xf32, #tpu.memory_space<vmem>>, vector<16x32xf32>
    %c0_2 = arith.constant 0 : index
    %c0_3 = arith.constant 0 : index
    %4 = vector.load %arg2[%c0_2, %c0_3] : memref<16x128xf32, #tpu.memory_space<vmem>>, vector<16x128xf32>
    %c0_4 = arith.constant 0 : index
    %c0_5 = arith.constant 0 : index
    %5 = vector.load %arg3[%c0_4, %c0_5] : memref<128x32xf32, #tpu.memory_space<vmem>>, vector<128x32xf32>
    %cst = arith.constant dense<0.000000e+00> : vector<16x32xf32>
    %6 = tpu.matmul %4, %5, %cst {dimension_numbers = #tpu.dot_dimension_numbers<[1], [0], [0], [1], [0, 0, 1, 1], [], []>} : vector<16x128xf32>, vector<128x32xf32>, vector<16x32xf32> -> vector<16x32xf32>
    %7 = arith.addf %3, %6 : vector<16x32xf32>
    %c0_6 = arith.constant 0 : index
    %c0_7 = arith.constant 0 : index
    %8 = vector.load %arg9[%c0_6, %c0_7] : memref<16x32xf32, #tpu.memory_space<vmem>>, vector<16x32xf32>
    tpu.vector_store %arg9[%c0_6, %c0_7], %7 {strides = array<i32>} : memref<16x32xf32, #tpu.memory_space<vmem>>, vector<16x32xf32>,
    %c0_i32_8 = arith.constant 0 : i32
    %9 = arith.cmpi eq, %arg1, %c0_i32_8 : i32
    %10 = arith.extui %9 : i1 to i32
    %c0_i32_9 = arith.constant 0 : i32
    %11 = arith.cmpi ne, %10, %c0_i32_9 : i32
    scf.if %11 {
      %c0_10 = arith.constant 0 : index
      %c0_11 = arith.constant 0 : index
      %12 = vector.load %arg9[%c0_10, %c0_11] : memref<16x32xf32, #tpu.memory_space<vmem>>, vector<16x32xf32>
      %c0_12 = arith.constant 0 : index
      %c0_13 = arith.constant 0 : index
      %13 = vector.load %arg4[%c0_12, %c0_13] : memref<1x32xf32, #tpu.memory_space<vmem>>, vector<1x32xf32>
      %14 = vector.broadcast %13 : vector<1x32xf32> to vector<16x32xf32>
      %15 = arith.addf %12, %14 : vector<16x32xf32>
      %c0_14 = arith.constant 0 : index
      %c0_15 = arith.constant 0 : index
      %16 = vector.load %arg5[%c0_14, %c0_15] : memref<16x32xf32, #tpu.memory_space<vmem>>, vector<16x32xf32>
      %17 = arith.addf %15, %16 : vector<16x32xf32>
      %cst_16 = arith.constant dense<0.000000e+00> : vector<16xf32>
      %18 = vector.multi_reduction <add>, %17, %cst_16 [1] : vector<16x32xf32> to vector<16xf32>
      %19 = vector.shape_cast %18 : vector<16xf32> to vector<16x1xf32>
      %cst_17 = arith.constant 3.200000e+01 : f32
      %20 = vector.broadcast %cst_17 : f32 to vector<16x1xf32>
      %21 = arith.divf %19, %20 : vector<16x1xf32>
      %22 = vector.broadcast %21 : vector<16x1xf32> to vector<16x32xf32>
      %23 = arith.subf %17, %22 : vector<16x32xf32>
      %24 = arith.mulf %23, %23 : vector<16x32xf32>
      %cst_18 = arith.constant dense<0.000000e+00> : vector<16xf32>
      %25 = vector.multi_reduction <add>, %24, %cst_18 [1] : vector<16x32xf32> to vector<16xf32>
      %26 = vector.shape_cast %25 : vector<16xf32> to vector<16x1xf32>
      %cst_19 = arith.constant 3.200000e+01 : f32
      %27 = vector.broadcast %cst_19 : f32 to vector<16x1xf32>
      %28 = arith.divf %26, %27 : vector<16x1xf32>
      %29 = vector.broadcast %21 : vector<16x1xf32> to vector<16x32xf32>
      %30 = arith.subf %17, %29 : vector<16x32xf32>
      %cst_20 = arith.constant 9.99999974E-6 : f32
      %31 = vector.broadcast %cst_20 : f32 to vector<16x1xf32>
      %32 = arith.addf %28, %31 : vector<16x1xf32>
      %33 = math.rsqrt %32 : vector<16x1xf32>
      %34 = vector.broadcast %33 : vector<16x1xf32> to vector<16x32xf32>
      %35 = arith.mulf %30, %34 : vector<16x32xf32>
      %c0_21 = arith.constant 0 : index
      %c0_22 = arith.constant 0 : index
      %36 = vector.load %arg6[%c0_21, %c0_22] : memref<1x32xf32, #tpu.memory_space<vmem>>, vector<1x32xf32>
      %37 = vector.broadcast %36 : vector<1x32xf32> to vector<16x32xf32>
      %38 = arith.mulf %35, %37 : vector<16x32xf32>
      %c0_23 = arith.constant 0 : index
      %c0_24 = arith.constant 0 : index
      %39 = vector.load %arg7[%c0_23, %c0_24] : memref<1x32xf32, #tpu.memory_space<vmem>>, vector<1x32xf32>
      %40 = vector.broadcast %39 : vector<1x32xf32> to vector<16x32xf32>
      %41 = arith.addf %38, %40 : vector<16x32xf32>
      %c0_25 = arith.constant 0 : index
      %c0_26 = arith.constant 0 : index
      %42 = vector.load %arg8[%c0_25, %c0_26] : memref<16x32xf32, #tpu.memory_space<vmem>>, vector<16x32xf32>
      tpu.vector_store %arg8[%c0_25, %c0_26], %41 {strides = array<i32>} : memref<16x32xf32, #tpu.memory_space<vmem>>, vector<16x32xf32>,
    } else {
    }
    return
  }
  func.func @transform_0(%arg0: i32, %arg1: i32) -> (i32, i32) {
    %c0_i32 = arith.constant 0 : i32
    return %arg0, %arg1 : i32, i32
  }
  func.func @transform_1(%arg0: i32, %arg1: i32) -> (i32, i32) {
    %c0_i32 = arith.constant 0 : i32
    %c0_i32_0 = arith.constant 0 : i32
    return %arg1, %c0_i32 : i32, i32
  }
  func.func @transform_2(%arg0: i32, %arg1: i32) -> (i32, i32) {
    %c0_i32 = arith.constant 0 : i32
    %c0_i32_0 = arith.constant 0 : i32
    %c0_i32_1 = arith.constant 0 : i32
    return %c0_i32, %c0_i32_0 : i32, i32
  }
  func.func @transform_3(%arg0: i32, %arg1: i32) -> (i32, i32) {
    %c0_i32 = arith.constant 0 : i32
    %c0_i32_0 = arith.constant 0 : i32
    return %arg0, %c0_i32 : i32, i32
  }
  func.func @transform_4(%arg0: i32, %arg1: i32) -> (i32, i32) {
    %c0_i32 = arith.constant 0 : i32
    %c0_i32_0 = arith.constant 0 : i32
    %c0_i32_1 = arith.constant 0 : i32
    return %c0_i32, %c0_i32_0 : i32, i32
  }
  func.func @transform_5(%arg0: i32, %arg1: i32) -> (i32, i32) {
    %c0_i32 = arith.constant 0 : i32
    %c0_i32_0 = arith.constant 0 : i32
    %c0_i32_1 = arith.constant 0 : i32
    return %c0_i32, %c0_i32_0 : i32, i32
  }
  func.func @transform_6(%arg0: i32, %arg1: i32) -> (i32, i32) {
    %c0_i32 = arith.constant 0 : i32
    %c0_i32_0 = arith.constant 0 : i32
    return %arg0, %c0_i32 : i32, i32
  }
}

</mosaic_0001>

<bundles_post_ra>
// kernel: decoder_layer.9
= control target key start
LH: loop header
LB: loop body
LE: loop exit
PB: predicated region body
PF: predicated region fallthrough
CT: control target
= control target key end

     0   :  { %vm29_vm0 = vcmask 261120   ;;  %vm18_vm1 = vcmask 785408   ;;  %v165_v3 = vmov 0.0   ;;  %s221_s1 = inlined_call_operand.vmem [shape: f32[32,96], index: 1, kind: input, shape index: {}]   ;;  %s222_s0 = inlined_call_operand.vmem [shape: f32[16,32], index: 0, kind: input, shape index: {}]   ;;  %s223_s2 = inlined_call_operand.vmem [shape: f32[1,96], index: 2, kind: input, shape index: {}]   ;;  %s224_s3 = inlined_call_operand.vmem [shape: f32[16,96], index: 3, kind: output, shape index: {}]  }
   0x1   :  { %v25_v0 = vld [vmem:[%s221_s1] sm:$0xff]  ;;  %v26_v1 = vld [vmem:[%s221_s1 + $0x8] sm:$0xff]  ;;  %v27_v2 = vld [vmem:[%s221_s1 + $0x10] sm:$0xff]  ;;  %20 = vst.msk [vmem:[#allocation2 + $0x8] sm:$0xff] %vm18_vm1, %v165_v3 }
   0x2   :  { %19 = vst.msk [vmem:[#allocation2] sm:$0xff] %vm18_vm1, %v165_v3  ;;  %v156_v4 = vpack.c.bf16 %v26_v1, %v25_v0  ;;  %v28_v5 = vld [vmem:[%s221_s1 + $0x18] sm:$0xff]  ;;  %v23_v6 = vld [vmem:[%s222_s0] sm:$0xff]  ;;  %v24_v8 = vld [vmem:[%s222_s0 + $0x8] sm:$0xff] }
   0x3   :  { %v160_v7 = vpack.c.bf16 %v28_v5, %v27_v2  ;;  %153 = vmatprep.mubr.msk.f32.mxu0 %vm29_vm0, %v23_v6  ;;  %v138_v15 = vld [vmem:[%s223_s2] ss:$0 sm:$0xff] }
   0x4   :  { %157 = vmatprep.subr.bf16.mxu0 %v156_v4 }
   0x5   :  { %159 = vmatpush3.bf16.msra.mxu0 %v156_v4 }
   0x6   :  { %161 = vmatprep.subr.bf16.mxu0 %v160_v7 }
   0x8   :  { %v22_v9 = vld [vmem:[#allocation2 + $0x8] sm:$0xff] }
   0x9   :  { %163 = vmatpush3.bf16.msra.mxu0 %v160_v7  ;;  %v21_v10 = vld [vmem:[#allocation2] sm:$0xff] }
   0xc   :  { %154 = vmatmul.mubr.msk.f32.vlgmr.msra.gmra.mrb[0].mxu0 %vm29_vm0, %v24_v8 }
  0xdf   :  { %v155_v11 = vpop.f32.mrb[0].mxu0 }
  0xe0   :  { %v112_v12 = vadd.f32 %v155_v11, %v22_v9  ;;  %v102_v13 = vpop.f32.mrb[1].mxu0 }
  0xe1   :  { %v111_v14 = vadd.f32 %v102_v13, %v21_v10 }
  0xe2   :  { %115 = vst.msk [vmem:[#allocation2 + $0x8] sm:$0xff] %vm18_vm1, %v112_v12 }
  0xe3   :  { %114 = vst.msk [vmem:[#allocation2] sm:$0xff] %vm18_vm1, %v111_v14 }
  0xe9   :  { %v120_v16 = vld [vmem:[#allocation2 + $0x8] sm:$0xff] }
  0xea   :  { %v129_v17 = vadd.f32 %v138_v15, %v120_v16  ;;  %v119_v18 = vld [vmem:[#allocation2] sm:$0xff] }
  0xeb   :  { %v128_v19 = vadd.f32 %v138_v15, %v119_v18 }
  0xec   :  { %131 = vst.msk [vmem:[%s224_s3 + $0x8] sm:$0xff] %vm18_vm1, %v129_v17 }
  0xed   :  { %130 = vst.msk [vmem:[%s224_s3] sm:$0xff] %vm18_vm1, %v128_v19 }

// kernel: decoder_layer.12
= control target key start
LH: loop header
LB: loop body
LE: loop exit
PB: predicated region body
PF: predicated region fallthrough
CT: control target
= control target key end

     0   :  { %vm18_vm0 = vcmask 261120   ;;  %v164_v3 = vmov 0.0   ;;  %s220_s1 = inlined_call_operand.vmem [shape: f32[32,32], index: 1, kind: input, shape index: {}]   ;;  %s221_s0 = inlined_call_operand.vmem [shape: f32[16,32], index: 0, kind: input, shape index: {}]   ;;  %s222_s2 = inlined_call_operand.vmem [shape: f32[1,32], index: 2, kind: input, shape index: {}]   ;;  %s223_s3 = inlined_call_operand.vmem [shape: f32[16,32], index: 3, kind: output, shape index: {}]  }
   0x1   :  { %v25_v0 = vld [vmem:[%s220_s1] sm:$0xff]  ;;  %v26_v1 = vld [vmem:[%s220_s1 + $0x8] sm:$0xff]  ;;  %v27_v2 = vld [vmem:[%s220_s1 + $0x10] sm:$0xff]  ;;  %20 = vst.msk [vmem:[#allocation2 + $0x8] sm:$0xff] %vm18_vm0, %v164_v3 }
   0x2   :  { %19 = vst.msk [vmem:[#allocation2] sm:$0xff] %vm18_vm0, %v164_v3  ;;  %v155_v4 = vpack.c.bf16 %v26_v1, %v25_v0  ;;  %v28_v5 = vld [vmem:[%s220_s1 + $0x18] sm:$0xff]  ;;  %v23_v6 = vld [vmem:[%s221_s0] sm:$0xff]  ;;  %v24_v8 = vld [vmem:[%s221_s0 + $0x8] sm:$0xff] }
   0x3   :  { %v159_v7 = vpack.c.bf16 %v28_v5, %v27_v2  ;;  %152 = vmatprep.mubr.msk.f32.mxu0 %vm18_vm0, %v23_v6  ;;  %v137_v15 = vld [vmem:[%s222_s2] ss:$0 sm:$0xff] }
   0x4   :  { %156 = vmatprep.subr.bf16.mxu0 %v155_v4 }
   0x5   :  { %158 = vmatpush3.bf16.msra.mxu0 %v155_v4 }
   0x6   :  { %160 = vmatprep.subr.bf16.mxu0 %v159_v7 }
   0x8   :  { %v22_v9 = vld [vmem:[#allocation2 + $0x8] sm:$0xff] }
   0x9   :  { %162 = vmatpush3.bf16.msra.mxu0 %v159_v7  ;;  %v21_v10 = vld [vmem:[#allocation2] sm:$0xff] }
   0xc   :  { %153 = vmatmul.mubr.msk.f32.vlgmr.msra.gmra.mrb[0].mxu0 %vm18_vm0, %v24_v8 }
  0xdf   :  { %v154_v11 = vpop.f32.mrb[0].mxu0 }
  0xe0   :  { %v112_v12 = vadd.f32 %v154_v11, %v22_v9  ;;  %v102_v13 = vpop.f32.mrb[1].mxu0 }
  0xe1   :  { %v111_v14 = vadd.f32 %v102_v13, %v21_v10 }
  0xe2   :  { %114 = vst.msk [vmem:[#allocation2 + $0x8] sm:$0xff] %vm18_vm0, %v112_v12 }
  0xe3   :  { %113 = vst.msk [vmem:[#allocation2] sm:$0xff] %vm18_vm0, %v111_v14 }
  0xe9   :  { %v119_v16 = vld [vmem:[#allocation2 + $0x8] sm:$0xff] }
  0xea   :  { %v128_v17 = vadd.f32 %v137_v15, %v119_v16  ;;  %v118_v18 = vld [vmem:[#allocation2] sm:$0xff] }
  0xeb   :  { %v127_v19 = vadd.f32 %v137_v15, %v118_v18 }
  0xec   :  { %130 = vst.msk [vmem:[%s223_s3 + $0x8] sm:$0xff] %vm18_vm0, %v128_v17 }
  0xed   :  { %129 = vst.msk [vmem:[%s223_s3] sm:$0xff] %vm18_vm0, %v127_v19 }

// kernel: decoder_layer.11
= control target key start
LH: loop header
LB: loop body
LE: loop exit
PB: predicated region body
PF: predicated region fallthrough
CT: control target
= control target key end

     0   :  { %vm27_vm0 = vcmask 261120   ;;  %v228_v3 = vmov 0.0   ;;  %s315_s1 = inlined_call_operand.vmem [shape: f32[32,32], index: 1, kind: input, shape index: {}]   ;;  %s316_s0 = inlined_call_operand.vmem [shape: f32[16,32], index: 0, kind: input, shape index: {}]   ;;  %s317_s2 = inlined_call_operand.vmem [shape: f32[1,32], index: 2, kind: input, shape index: {}]   ;;  %s318_s3 = inlined_call_operand.vmem [shape: f32[16,32], index: 3, kind: input, shape index: {}]   ;;  %s319_s4 = inlined_call_operand.vmem [shape: f32[1,32], index: 4, kind: input, shape index: {}]   ;;  %s320_s5 = inlined_call_operand.vmem [shape: f32[1,32], index: 5, kind: input, shape index: {}]   ;;  %s321_s6 = inlined_call_operand.vmem [shape: f32[16,32], index: 6, kind: output, shape index: {}]  }
   0x1   :  { %v34_v0 = vld [vmem:[%s315_s1] sm:$0xff]  ;;  %v35_v1 = vld [vmem:[%s315_s1 + $0x8] sm:$0xff]  ;;  %v36_v2 = vld [vmem:[%s315_s1 + $0x10] sm:$0xff]  ;;  %29 = vst.msk [vmem:[#allocation2 + $0x8] sm:$0xff] %vm27_vm0, %v228_v3 }
   0x2   :  { %28 = vst.msk [vmem:[#allocation2] sm:$0xff] %vm27_vm0, %v228_v3  ;;  %v215_v4 = vpack.c.bf16 %v35_v1, %v34_v0  ;;  %v37_v5 = vld [vmem:[%s315_s1 + $0x18] sm:$0xff]  ;;  %v32_v6 = vld [vmem:[%s316_s0] sm:$0xff]  ;;  %v33_v8 = vld [vmem:[%s316_s0 + $0x8] sm:$0xff] }
   0x3   :  { %v219_v7 = vpack.c.bf16 %v37_v5, %v36_v2  ;;  %212 = vmatprep.mubr.msk.f32.mxu0 %vm27_vm0, %v32_v6  ;;  %v195_v15 = vld [vmem:[%s317_s2] ss:$0 sm:$0xff]  ;;  %v139_v21 = vld [vmem:[%s318_s3 + $0x8] sm:$0xff] }
   0x4   :  { %216 = vmatprep.subr.bf16.mxu0 %v215_v4  ;;  %v138_v18 = vld [vmem:[%s318_s3] sm:$0xff] }
   0x5   :  { %218 = vmatpush3.bf16.msra.mxu0 %v215_v4  ;;  %v196_v43 = vld [vmem:[%s319_s4] ss:$0 sm:$0xff] }
   0x6   :  { %220 = vmatprep.subr.bf16.mxu0 %v219_v7  ;;  %v197_v45 = vld [vmem:[%s320_s5] ss:$0 sm:$0xff] }
   0x8   :  { %v31_v9 = vld [vmem:[#allocation2 + $0x8] sm:$0xff] }
   0x9   :  { %222 = vmatpush3.bf16.msra.mxu0 %v219_v7  ;;  %v30_v10 = vld [vmem:[#allocation2] sm:$0xff] }
   0xc   :  { %213 = vmatmul.mubr.msk.f32.vlgmr.msra.gmra.mrb[0].mxu0 %vm27_vm0, %v33_v8 }
  0xdf   :  { %v214_v11 = vpop.f32.mrb[0].mxu0 }
  0xe0   :  { %v121_v12 = vadd.f32 %v214_v11, %v31_v9  ;;  %v111_v13 = vpop.f32.mrb[1].mxu0 }
  0xe1   :  { %v120_v14 = vadd.f32 %v111_v13, %v30_v10 }
  0xe2   :  { %123 = vst.msk [vmem:[#allocation2 + $0x8] sm:$0xff] %vm27_vm0, %v121_v12 }
  0xe3   :  { %122 = vst.msk [vmem:[#allocation2] sm:$0xff] %vm27_vm0, %v120_v14 }
  0xe9   :  { %v128_v16 = vld [vmem:[#allocation2 + $0x8] sm:$0xff] }
  0xea   :  { %v127_v17 = vld [vmem:[#allocation2] sm:$0xff]  ;;  %v137_v20 = vadd.f32 %v195_v15, %v128_v16 }
  0xeb   :  { %v136_v19 = vadd.f32 %v195_v15, %v127_v17 }
  0xec   :  { %v141_v24 = vadd.f32 %v139_v21, %v137_v20 }
  0xed   :  { %v140_v22 = vadd.f32 %v138_v18, %v136_v19 }
  0xee   :  { %v145_v25 = vsel %vm27_vm0, %v141_v24, 0.0 }
  0xef   :  { %v142_v23 = vsel %vm27_vm0, %v140_v22, 0.0 }
  0xf0   :  { %143 = vadd.xlane.f32.xlu0 %v142_v23 }
  0xf4   :  { %146 = vadd.xlane.f32.xlu0 %v145_v25 }
 0x17d   :  { %v144_v26 = vpop.xlane.xlu0 %143 }
 0x17e   :  { %v149_v27 = vmul.f32 0.03125, %v144_v26 }
 0x180   :  { %v151_v28 = vsub.f32 %v140_v22, %v149_v27 }
 0x181   :  { %v147_v29 = vpop.xlane.xlu0 %146 }
 0x182   :  { %v150_v30 = vmul.f32 0.03125, %v147_v29  ;;  %v153_v31 = vmul.f32 %v151_v28, %v151_v28 }
 0x184   :  { %v152_v32 = vsub.f32 %v141_v24, %v150_v30  ;;  %v155_v33 = vsel %vm27_vm0, %v153_v31, 0.0 }
 0x185   :  { %156 = vadd.xlane.f32.xlu1 %v155_v33 }
 0x186   :  { %v154_v34 = vmul.f32 %v152_v32, %v152_v32 }
 0x188   :  { %v158_v35 = vsel %vm27_vm0, %v154_v34, 0.0 }
 0x189   :  { %159 = vadd.xlane.f32.xlu1 %v158_v35 }
 0x212   :  { %v157_v36 = vpop.xlane.xlu1 %156 }
 0x213   :  { %v161_v37 = vmul.f32 0.03125, %v157_v36 }
 0x215   :  { %v163_v38 = vadd.f32 1e-05, %v161_v37 }
 0x216   :  { %v160_v39 = vpop.xlane.xlu1 %159 }
 0x217   :  { %224 = vrsqrt.f32 %v163_v38  ;;  %v162_v40 = vmul.f32 0.03125, %v160_v39 }
 0x219   :  { %v164_v41 = vadd.f32 1e-05, %v162_v40 }
 0x21b   :  { %226 = vrsqrt.f32 %v164_v41 }
 0x221   :  { %v225_v42 = vpop.eup %224 }
 0x222   :  { %v167_v44 = vmul.f32 %v225_v42, %v151_v28 }
 0x224   :  { %v176_v46 = vmul.f32 %v196_v43, %v167_v44 }
 0x225   :  { %v227_v47 = vpop.eup %226 }
 0x226   :  { %v185_v48 = vadd.f32 %v197_v45, %v176_v46  ;;  %v168_v49 = vmul.f32 %v227_v47, %v152_v32 }
 0x228   :  { %187 = vst.msk [vmem:[%s321_s6] sm:$0xff] %vm27_vm0, %v185_v48  ;;  %v177_v50 = vmul.f32 %v196_v43, %v168_v49 }
 0x22a   :  { %v186_v51 = vadd.f32 %v197_v45, %v177_v50 }
 0x22c   :  { %188 = vst.msk [vmem:[%s321_s6 + $0x8] sm:$0xff] %vm27_vm0, %v186_v51 }

// kernel: decoder_layer.10
= control target key start
LH: loop header
LB: loop body
LE: loop exit
PB: predicated region body
PF: predicated region fallthrough
CT: control target
= control target key end

     0   :  { %s1408_s12 = smov 0   ;;  %s1410_s13 = smov 0   ;;  %s1557_s0 = inlined_call_operand.vmem [shape: f32[2,4,8,8], index: 0, kind: input, shape index: {}]   ;;  %s1558_s1 = inlined_call_operand.vmem [shape: f32[2,4,8,8], index: 1, kind: input, shape index: {}]   ;;  %s1559_s2 = inlined_call_operand.vmem [shape: f32[2,4,8,8], index: 2, kind: input, shape index: {}]   ;;  %s1560_s3 = inlined_call_operand.vmem [shape: f32[2,4,8,8], index: 3, kind: output, shape index: {}]  }
   0x1   :  { %s1412_s14 = smov 0  }
   0x2 LB: > { %s32_s15 = sadd.s32 1, %s1378_s13  ;;  %p1223_p0 = scmp.ge.s32.totalorder %s1382_s14, 1  ;;  %s1382_s14 = sphi %s1412_s14, %s13_s14   ;;  %s1378_s13 = sphi %s1410_s13, %s1562_s13   ;;  %s1374_s12 = sphi %s1408_s12, %s1561_s12  }
   0x3   : > { %p34_p1 = scmp.ge.s32.totalorder %s32_s15, 2  ;;  %p193_p2 = scmp.lt.s32.totalorder %s1382_s14, 3 }
   0x5   : > { %s1564_s15 = smov (%p34_p1, %s32_s15), 0  ;;  %p194_p3 = pnand %p1223_p0, %p193_p2 }
   0x6   : > { %p239_p4 = scmp.lt.s32.totalorder (!%p194_p3), %s1374_s12, 1  ;;  %vm284_vm0 = vcmask (!%p194_p3), 64512   ;;  %v1384_v0 = vmov (!%p194_p3), 0.0   ;;  %vm1385_vm1 = vmmov (!%p194_p3), 0   ;;  %vm275_vm2 = vcmask (!%p194_p3), 7168  }
   0x7   : > { %197 = sbr.rel (%p194_p3) target bundleno = 829 (0x33d), region = 32  ;;  %1266 = vmatprep.subr.mxu0 (!%p194_p3), %v1384_v0  ;;  %285 = vst.msk [vmem:[#allocation4] sm:$0xff] (!%p194_p3), %vm284_vm0, %v1384_v0  ;;  %286 = vst.msk [vmem:[#allocation4 + $0x8] sm:$0xff] (!%p194_p3), %vm284_vm0, %v1384_v0  ;;  %1268 = vmatprep.mubr.msk.f32.mxu0 (!%p194_p3), %vm1385_vm1, %v1384_v0  ;;  %v1386_v9 = vmov (!%p194_p3), -1e+30   ;;  %v613_v10 = vlaneseq (!%p194_p3)  ;;  %v1387_v29 = vmov (!%p194_p3), 0  }
   0x8   : > { %287 = vst.msk [vmem:[#allocation4 + $0x10] sm:$0xff] (!%p194_p3), %vm284_vm0, %v1384_v0  ;;  %288 = vst.msk [vmem:[#allocation4 + $0x18] sm:$0xff] (!%p194_p3), %vm284_vm0, %v1384_v0  ;;  %1271 = vmatprep.subr.mxu1 (!%p194_p3), %v1384_v0  ;;  %1273 = vmatprep.mubr.msk.f32.mxu1 (!%p194_p3), %vm1385_vm1, %v1384_v0 }
   0x9   : > { %276 = vst.msk [vmem:[#allocation2] sm:$0xff] (!%p194_p3), %vm275_vm2, %v1386_v9  ;;  %277 = vst.msk [vmem:[#allocation2 + $0x8] sm:$0xff] (!%p194_p3), %vm275_vm2, %v1386_v9  ;;  %v614_v11 = vshrl.u32 (!%p194_p3), %v613_v10, 7  ;;  %v618_v12 = vand.u32 (!%p194_p3), 127, %v613_v10  ;;  %1334 = vset.pattern.permute.xlu0 (!%p194_p3), %v1387_v29  ;;  %1335 = vset.pattern.permute.xlu1 (!%p194_p3), %v1387_v29 }
   0xa   : > { %278 = vst.msk [vmem:[#allocation2 + $0x10] sm:$0xff] (!%p194_p3), %vm275_vm2, %v1386_v9  ;;  %279 = vst.msk [vmem:[#allocation2 + $0x18] sm:$0xff] (!%p194_p3), %vm275_vm2, %v1386_v9 }
   0xb   : > { %280 = vst.msk [vmem:[#allocation3] sm:$0xff] (!%p194_p3), %vm275_vm2, %v1384_v0  ;;  %281 = vst.msk [vmem:[#allocation3 + $0x8] sm:$0xff] (!%p194_p3), %vm275_vm2, %v1384_v0  ;;  %vm621_vm3 = vcmp.gt.s32.totalorder (!%p194_p3), %v618_v12, %v614_v11 }
   0xc   : > { %282 = vst.msk [vmem:[#allocation3 + $0x10] sm:$0xff] (!%p194_p3), %vm275_vm2, %v1384_v0  ;;  %283 = vst.msk [vmem:[#allocation3 + $0x18] sm:$0xff] (!%p194_p3), %vm275_vm2, %v1384_v0 }
   0xe   : > { %s1566_s12 = smov (!%p239_p4, %s1374_s12), 1 }
   0xf   : > { %s1440_s16 = sshll.u32 %s1566_s12, 5 }
  0x10   : > { %s254_s19 = scalar_lea.vmem %s1558_s1, %s1440_s16  ;;  %s246_s22 = scalar_lea.vmem %s1557_s0, %s1440_s16  ;;  %v1486_v30 = vld [vmem:[#allocation2] sm:$0xff]  ;;  %v1491_v33 = vld [vmem:[#allocation2 + $0x8] sm:$0xff] }
  0x11   : > { %v300_v1 = vld [vmem:[%s254_s19] sm:$0xff]  ;;  %v301_v2 = vld [vmem:[%s254_s19 + $0x8] sm:$0xff]  ;;  %v302_v5 = vld [vmem:[%s254_s19 + $0x10] sm:$0xff]  ;;  %s262_s25 = scalar_lea.vmem %s1559_s2, %s1440_s16  ;;  %s270_s28 = scalar_lea.vmem %s1560_s3, %s1440_s16 }
  0x12   : > { %1267 = vmatpush3.xpose.msk.msra.mxu0 %vm284_vm0, %v300_v1  ;;  %v296_v3 = vld [vmem:[%s246_s22] sm:$0xff]  ;;  %1272 = vmatpush3.xpose.msk.msra.mxu1 %vm284_vm0, %v301_v2  ;;  %v297_v4 = vld [vmem:[%s246_s22 + $0x8] sm:$0xff]  ;;  %v303_v6 = vld [vmem:[%s254_s19 + $0x18] sm:$0xff] }
  0x13   : > { %1276 = vmatprep.subr.mxu0 %v1384_v0  ;;  %1281 = vmatprep.subr.mxu1 %v1384_v0  ;;  %v298_v7 = vld [vmem:[%s246_s22 + $0x10] sm:$0xff]  ;;  %v299_v8 = vld [vmem:[%s246_s22 + $0x18] sm:$0xff]  ;;  %v304_v46 = vld [vmem:[%s262_s25] sm:$0xff] }
  0x14   : > { %v1493_v34 = vld [vmem:[#allocation2 + $0x10] sm:$0xff]  ;;  %v1502_v40 = vld [vmem:[#allocation2 + $0x18] sm:$0xff]  ;;  %v305_v47 = vld [vmem:[%s262_s25 + $0x8] sm:$0xff] }
  0x15   : > { %1269 = vmatmul.mubr.msk.f32.vlgmr.msra.gmra.mrb[0].mxu0 %vm284_vm0, %v296_v3  ;;  %1274 = vmatmul.mubr.msk.f32.vlgmr.msra.gmra.mrb[0].mxu1 %vm284_vm0, %v297_v4  ;;  %v306_v59 = vld [vmem:[%s262_s25 + $0x10] sm:$0xff]  ;;  %v307_v63 = vld [vmem:[%s262_s25 + $0x18] sm:$0xff] }
  0x16   : > { %1277 = vmatpush3.xpose.msk.msra.mxu0 %vm284_vm0, %v302_v5  ;;  %1278 = vmatprep.mubr.msk.f32.mxu0 %vm1385_vm1, %v1384_v0 }
  0x17   : > { %1282 = vmatpush3.xpose.msk.msra.mxu1 %vm284_vm0, %v303_v6  ;;  %1283 = vmatprep.mubr.msk.f32.mxu1 %vm1385_vm1, %v1384_v0 }
  0x18   : > { %1286 = vmatprep.subr.mxu0 %v1384_v0  ;;  %1291 = vmatprep.subr.mxu1 %v1384_v0 }
  0x19   : > { %1279 = vmatmul.mubr.msk.f32.vlgmr.msra.gmra.mrb[2].mxu0 %vm284_vm0, %v298_v7 }
  0x1a   : > { %1284 = vmatmul.mubr.msk.f32.vlgmr.msra.gmra.mrb[2].mxu1 %vm284_vm0, %v299_v8  ;;  %1288 = vmatprep.mubr.msk.f32.mxu0 %vm1385_vm1, %v1384_v0 }
  0x1b   : > { %1293 = vmatprep.mubr.msk.f32.mxu1 %vm1385_vm1, %v1384_v0  ;;  %1287 = vmatpush3.msra.mxu0 %v304_v46 }
  0x1c   : > { %1296 = vmatprep.subr.mxu0 %v1384_v0  ;;  %1292 = vmatpush3.msra.mxu1 %v305_v47 }
  0x1d   : > { %1301 = vmatprep.subr.mxu1 %v1384_v0 }
  0xe8   : > { %v381_v13 = vpop.f32.mrb[0].mxu0  ;;  %v457_v14 = vpop.f32.mrb[0].mxu1 }
  0xe9   : > { %v624_v15 = vsel %vm621_vm3, -1e+30, %v381_v13  ;;  %v1270_v16 = vpop.f32.mrb[1].mxu0  ;;  %v625_v17 = vsel %vm621_vm3, -1e+30, %v457_v14  ;;  %v1275_v18 = vpop.f32.mrb[1].mxu1 }
  0xea   : > { %v632_v19 = vsel %vm284_vm0, %v624_v15, -inf  ;;  %v635_v20 = vsel %vm284_vm0, %v625_v17, -inf  ;;  %v692_v14 = vld [vmem:[#allocation3] sm:$0xff] }
  0xeb   : > { %633 = vmax.xlane.f32.xlu0 %v632_v19 }
  0xec   : > { %v533_v21 = vpop.f32.mrb[2].mxu0 }
  0xed   : > { %v626_v22 = vsel %vm621_vm3, -1e+30, %v533_v21  ;;  %v1280_v23 = vpop.f32.mrb[3].mxu0  ;;  %v609_v24 = vpop.f32.mrb[2].mxu1  ;;  %v694_v21 = vld [vmem:[#allocation3 + $0x10] sm:$0xff] }
  0xee   : > { %v627_v25 = vsel %vm621_vm3, -1e+30, %v609_v24  ;;  %v638_v26 = vsel %vm284_vm0, %v626_v22, -inf  ;;  %v1285_v27 = vpop.f32.mrb[3].mxu1 }
  0xef   : > { %636 = vmax.xlane.f32.xlu0 %v635_v20  ;;  %639 = vmax.xlane.f32.xlu1 %v638_v26  ;;  %v641_v28 = vsel %vm284_vm0, %v627_v25, -inf }
  0xf3   : > { %642 = vmax.xlane.f32.xlu1 %v641_v28 }
 0x178   : > { %v634_v31 = vpop.xlane.xlu0 %633 }
 0x179   : > { %v1489_v32 = vmax.f32 %v1486_v30, %v634_v31 }
 0x17b   : > { %v648_v35 = vsub.f32 %v1486_v30, %v1489_v32  ;;  %1049 = vst.msk [vmem:[#allocation2] sm:$0xff] %vm275_vm2, %v1489_v32  ;;  %662 = vperm.xlu0 %1334, %v1489_v32  }
 0x17c   : > { %v637_v36 = vpop.xlane.xlu0 %636  ;;  %v640_v37 = vpop.xlane.xlu1 %639 }
 0x17d   : > { %v645_v38 = vmax.f32 %v1491_v33, %v637_v36  ;;  %v646_v39 = vmax.f32 %v1493_v34, %v640_v37  ;;  %v652_v8 = vmul.f32 1.442695, %v648_v35 }
 0x17f   : > { %v649_v41 = vsub.f32 %v1491_v33, %v645_v38  ;;  %1050 = vst.msk [vmem:[#allocation2 + $0x8] sm:$0xff] %vm275_vm2, %v645_v38  ;;  %667 = vperm.xlu1 %1335, %v645_v38   ;;  %v650_v42 = vsub.f32 %v1493_v34, %v646_v39  ;;  %1051 = vst.msk [vmem:[#allocation2 + $0x10] sm:$0xff] %vm275_vm2, %v646_v39  ;;  %v721_v38 = vld [vmem:[#allocation4] sm:$0xff] }
 0x180   : > { %v643_v43 = vpop.xlane.xlu1 %642 }
 0x181   : > { %v647_v44 = vmax.f32 %v1502_v40, %v643_v43  ;;  %v654_v6 = vmul.f32 1.442695, %v649_v41  ;;  %v722_v41 = vld [vmem:[#allocation4 + $0x8] sm:$0xff] }
 0x183   : > { %672 = vperm.xlu1 %1335, %v646_v39   ;;  %v651_v45 = vsub.f32 %v1502_v40, %v647_v44  ;;  %1052 = vst.msk [vmem:[#allocation2 + $0x18] sm:$0xff] %vm275_vm2, %v647_v44 }
 0x185   : > { %v658_v9 = vmul.f32 1.442695, %v651_v45 }
 0x187   : > { %677 = vperm.xlu1 %1335, %v647_v44  }
 0x1fa   : > { %v663_v48 = vpop.permute.xlu0 %662 }
 0x1fb   : > { %v680_v49 = vsub.f32 %v624_v15, %v663_v48  ;;  %v723_v48 = vld [vmem:[#allocation4 + $0x10] sm:$0xff] }
 0x1fd   : > { %v684_v50 = vmul.f32 1.442695, %v680_v49 }
 0x1fe   : > { %v668_v51 = vpop.permute.xlu1 %667 }
 0x1ff   : > { %1336 = vpow2.f32 %v684_v50  ;;  %v681_v52 = vsub.f32 %v625_v17, %v668_v51  ;;  %v693_v17 = vld [vmem:[#allocation3 + $0x8] sm:$0xff] }
 0x201   : > { %v686_v53 = vmul.f32 1.442695, %v681_v52 }
 0x202   : > { %v673_v54 = vpop.permute.xlu1 %672 }
 0x203   : > { %1338 = vpow2.f32 %v686_v53  ;;  %v682_v55 = vsub.f32 %v626_v22, %v673_v54  ;;  %v724_v53 = vld [vmem:[#allocation4 + $0x18] sm:$0xff] }
 0x205   : > { %v688_v56 = vmul.f32 1.442695, %v682_v55 }
 0x206   : > { %v678_v57 = vpop.permute.xlu1 %677 }
 0x207   : > { %1340 = vpow2.f32 %v688_v56  ;;  %v683_v58 = vsub.f32 %v627_v25, %v678_v57  ;;  %v695_v25 = vld [vmem:[#allocation3 + $0x18] sm:$0xff] }
 0x209   : > { %v1337_v60 = vpop.eup %1336  ;;  %v690_v61 = vmul.f32 1.442695, %v683_v58 }
 0x20a   : > { %1289 = vmatmul.mubr.msk.f32.vlgmr.msra.gmra.mrb[4].mxu0 %vm284_vm0, %v1337_v60  ;;  %v700_v62 = vsel %vm284_vm0, %v1337_v60, 0.0 }
 0x20b   : > { %1342 = vpow2.f32 %v690_v61  ;;  %701 = vadd.xlane.f32.xlu1 %v700_v62  ;;  %1297 = vmatpush3.msra.mxu0 %v306_v59 }
 0x20c   : > { %1298 = vmatprep.mubr.msk.f32.mxu0 %vm1385_vm1, %v1384_v0  ;;  %1344 = vpow2.f32 %v654_v6 }
 0x20d   : > { %v1339_v1 = vpop.eup %1338  ;;  %1346 = vpow2.f32 %v652_v8 }
 0x20e   : > { %1294 = vmatmul.mubr.msk.f32.vlgmr.msra.gmra.mrb[4].mxu1 %vm284_vm0, %v1339_v1  ;;  %v703_v2 = vsel %vm284_vm0, %v1339_v1, 0.0 }
 0x20f   : > { %704 = vadd.xlane.f32.xlu0 %v703_v2  ;;  %1302 = vmatpush3.msra.mxu1 %v307_v63 }
 0x210   : > { %1303 = vmatprep.mubr.msk.f32.mxu1 %vm1385_vm1, %v1384_v0  ;;  %v656_v0 = vmul.f32 1.442695, %v650_v42 }
 0x211   : > { %v1341_v3 = vpop.eup %1340 }
 0x212   : > { %1299 = vmatmul.mubr.msk.f32.vlgmr.msra.gmra.mrb[6].mxu0 %vm284_vm0, %v1341_v3  ;;  %v706_v4 = vsel %vm284_vm0, %v1341_v3, 0.0  ;;  %1348 = vpow2.f32 %v656_v0 }
 0x213   : > { %707 = vadd.xlane.f32.xlu1 %v706_v4  ;;  %1350 = vpow2.f32 %v658_v9 }
 0x215   : > { %v1343_v5 = vpop.eup %1342 }
 0x216   : > { %1304 = vmatmul.mubr.msk.f32.vlgmr.msra.gmra.mrb[6].mxu1 %vm284_vm0, %v1343_v5  ;;  %v709_v7 = vsel %vm284_vm0, %v1343_v5, 0.0  ;;  %v1345_v10 = vpop.eup %1344 }
 0x217   : > { %710 = vadd.xlane.f32.xlu1 %v709_v7  ;;  %v1347_v11 = vpop.eup %1346  ;;  %v697_v19 = vmul.f32 %v1345_v10, %v693_v17 }
 0x218   : > { %v696_v15 = vmul.f32 %v1347_v11, %v692_v14 }
 0x21c   : > { %v1349_v12 = vpop.eup %1348 }
 0x21d   : > { %v1351_v13 = vpop.eup %1350  ;;  %v698_v23 = vmul.f32 %v1349_v12, %v694_v21 }
 0x21e   : > { %v699_v28 = vmul.f32 %v1351_v13, %v695_v25 }
 0x225   : > { %732 = vperm.xlu0 %1334, %v1345_v10  }
 0x228   : > { %727 = vperm.xlu1 %1335, %v1347_v11  }
 0x22c   : > { %737 = vperm.xlu1 %1335, %v1349_v12  }
 0x230   : > { %742 = vperm.xlu1 %1335, %v1351_v13  }
 0x298   : > { %v702_v16 = vpop.xlane.xlu1 %701 }
 0x299   : > { %v712_v18 = vadd.f32 %v702_v16, %v696_v15 }
 0x29b   : > { %717 = vst.msk [vmem:[#allocation3] sm:$0xff] %vm275_vm2, %v712_v18 }
 0x29c   : > { %v705_v20 = vpop.xlane.xlu0 %704 }
 0x29d   : > { %v713_v22 = vadd.f32 %v705_v20, %v697_v19 }
 0x29f   : > { %718 = vst.msk [vmem:[#allocation3 + $0x8] sm:$0xff] %vm275_vm2, %v713_v22 }
 0x2a0   : > { %v708_v24 = vpop.xlane.xlu1 %707 }
 0x2a1   : > { %v714_v26 = vadd.f32 %v708_v24, %v698_v23 }
 0x2a2   : > { %v1056_v27 = vld [vmem:[#allocation3] sm:$0xff] }
 0x2a3   : > { %719 = vst.msk [vmem:[#allocation3 + $0x10] sm:$0xff] %vm275_vm2, %v714_v26  ;;  %1352 = vrcp.f32 %v1056_v27 }
 0x2a4   : > { %v711_v29 = vpop.xlane.xlu1 %710  ;;  %v733_v42 = vpop.permute.xlu0 %732 }
 0x2a5   : > { %v715_v30 = vadd.f32 %v711_v29, %v699_v28  ;;  %v746_v47 = vmul.f32 %v733_v42, %v722_v41 }
 0x2a6   : > { %v1057_v31 = vld [vmem:[#allocation3 + $0x8] sm:$0xff] }
 0x2a7   : > { %720 = vst.msk [vmem:[#allocation3 + $0x18] sm:$0xff] %vm275_vm2, %v715_v30  ;;  %1354 = vrcp.f32 %v1057_v31 }
 0x2a8   : > { %v728_v39 = vpop.permute.xlu1 %727 }
 0x2a9   : > { %v745_v40 = vmul.f32 %v728_v39, %v721_v38 }
 0x2aa   : > { %v1058_v32 = vld [vmem:[#allocation3 + $0x10] sm:$0xff] }
 0x2ab   : > { %1356 = vrcp.f32 %v1058_v32 }
 0x2ac   : > { %v738_v46 = vpop.permute.xlu1 %737 }
 0x2ad   : > { %v1353_v33 = vpop.eup %1352  ;;  %v747_v52 = vmul.f32 %v738_v46, %v723_v48 }
 0x2ae   : > { %1070 = vperm.xlu1 %1335, %v1353_v33   ;;  %v1059_v34 = vld [vmem:[#allocation3 + $0x18] sm:$0xff] }
 0x2af   : > { %1358 = vrcp.f32 %v1059_v34 }
 0x2b0   : > { %v743_v54 = vpop.permute.xlu1 %742 }
 0x2b1   : > { %v1355_v35 = vpop.eup %1354  ;;  %v748_v58 = vmul.f32 %v743_v54, %v724_v53 }
 0x2b2   : > { %1075 = vperm.xlu0 %1334, %v1355_v35  }
 0x2b5   : > { %v1357_v36 = vpop.eup %1356 }
 0x2b6   : > { %1080 = vperm.xlu1 %1335, %v1357_v36  }
 0x2b9   : > { %v1359_v37 = vpop.eup %1358 }
 0x2ba   : > { %1085 = vperm.xlu0 %1334, %v1359_v37  }
 0x2dd   : > { %v818_v43 = vpop.f32.mrb[4].mxu0 }
 0x2de   : > { %v1041_v44 = vadd.f32 %v818_v43, %v745_v40  ;;  %v1290_v45 = vpop.f32.mrb[5].mxu0 }
 0x2e0   : > { %1045 = vst.msk [vmem:[#allocation4] sm:$0xff] %vm284_vm0, %v1041_v44 }
 0x2e1   : > { %v891_v49 = vpop.f32.mrb[4].mxu1 }
 0x2e2   : > { %v1042_v50 = vadd.f32 %v891_v49, %v746_v47  ;;  %v1295_v51 = vpop.f32.mrb[5].mxu1 }
 0x2e4   : > { %1046 = vst.msk [vmem:[#allocation4 + $0x8] sm:$0xff] %vm284_vm0, %v1042_v50 }
 0x2e5   : > { %v964_v55 = vpop.f32.mrb[6].mxu0 }
 0x2e6   : > { %v1043_v56 = vadd.f32 %v964_v55, %v747_v52  ;;  %v1300_v57 = vpop.f32.mrb[7].mxu0 }
 0x2e7   : > { %v1064_v63 = vld [vmem:[#allocation4] sm:$0xff] }
 0x2e8   : > { %1047 = vst.msk [vmem:[#allocation4 + $0x10] sm:$0xff] %vm284_vm0, %v1043_v56 }
 0x2e9   : > { %v1037_v59 = vpop.f32.mrb[6].mxu1 }
 0x2ea   : > { %v1044_v60 = vadd.f32 %v1037_v59, %v748_v58  ;;  %v1305_v61 = vpop.f32.mrb[7].mxu1 }
 0x2eb   : > { %v1065_v2 = vld [vmem:[#allocation4 + $0x8] sm:$0xff] }
 0x2ec   : > { %1048 = vst.msk [vmem:[#allocation4 + $0x18] sm:$0xff] %vm284_vm0, %v1044_v60 }
 0x2ef   : > { %v1066_v6 = vld [vmem:[#allocation4 + $0x10] sm:$0xff] }
 0x2f3   : > { %v1067_v0 = vld [vmem:[#allocation4 + $0x18] sm:$0xff] }
 0x32d   : > { %v1071_v62 = vpop.permute.xlu1 %1070 }
 0x32e   : > { %v1088_v1 = vmul.f32 %v1071_v62, %v1064_v63 }
 0x330   : > { %1093 = vst.msk [vmem:[%s270_s28] sm:$0xff] %vm284_vm0, %v1088_v1 }
 0x331   : > { %v1076_v3 = vpop.permute.xlu0 %1075 }
 0x332   : > { %v1089_v4 = vmul.f32 %v1076_v3, %v1065_v2 }
 0x334   : > { %1094 = vst.msk [vmem:[%s270_s28 + $0x8] sm:$0xff] %vm284_vm0, %v1089_v4 }
 0x335   : > { %v1081_v5 = vpop.permute.xlu1 %1080 }
 0x336   : > { %v1090_v7 = vmul.f32 %v1081_v5, %v1066_v6 }
 0x338   : > { %1095 = vst.msk [vmem:[%s270_s28 + $0x10] sm:$0xff] %vm284_vm0, %v1090_v7 }
 0x339   : > { %v1086_v8 = vpop.permute.xlu0 %1085 }
 0x33a   : > { %v1091_v9 = vmul.f32 %v1086_v8, %v1067_v0 }
 0x33c   : > { %1096 = vst.msk [vmem:[%s270_s28 + $0x18] sm:$0xff] %vm284_vm0, %v1091_v9 }
 0x33d PF: > { %s13_s14 = sadd.s32 1, %s1382_s14   ;;  %s1561_s12 = smov %s1378_s13 }
 0x33e   : > { %p10_p5 = scmp.ge.s32.totalorder %s13_s14, 4   ;;  %s1562_s13 = smov %s1564_s15 }
 0x340   :  { %12 = sbr.rel (!%p10_p5) target bundleno = 2 (0x2), region = 80 }

// kernel: decoder_layer.13
= control target key start
LH: loop header
LB: loop body
LE: loop exit
PB: predicated region body
PF: predicated region fallthrough
CT: control target
= control target key end

     0   :  { %vm29_vm0 = vcmask 261120   ;;  %vm18_vm1 = vcmask 523264   ;;  %v165_v3 = vmov 0.0   ;;  %s221_s1 = inlined_call_operand.vmem [shape: f32[32,64], index: 1, kind: input, shape index: {}]   ;;  %s222_s0 = inlined_call_operand.vmem [shape: f32[16,32], index: 0, kind: input, shape index: {}]   ;;  %s223_s2 = inlined_call_operand.vmem [shape: f32[1,64], index: 2, kind: input, shape index: {}]   ;;  %s224_s3 = inlined_call_operand.vmem [shape: f32[16,64], index: 3, kind: output, shape index: {}]  }
   0x1   :  { %v25_v0 = vld [vmem:[%s221_s1] sm:$0xff]  ;;  %v26_v1 = vld [vmem:[%s221_s1 + $0x8] sm:$0xff]  ;;  %v27_v2 = vld [vmem:[%s221_s1 + $0x10] sm:$0xff]  ;;  %20 = vst.msk [vmem:[#allocation2 + $0x8] sm:$0xff] %vm18_vm1, %v165_v3 }
   0x2   :  { %19 = vst.msk [vmem:[#allocation2] sm:$0xff] %vm18_vm1, %v165_v3  ;;  %v156_v4 = vpack.c.bf16 %v26_v1, %v25_v0  ;;  %v28_v5 = vld [vmem:[%s221_s1 + $0x18] sm:$0xff]  ;;  %v23_v6 = vld [vmem:[%s222_s0] sm:$0xff]  ;;  %v24_v8 = vld [vmem:[%s222_s0 + $0x8] sm:$0xff] }
   0x3   :  { %v160_v7 = vpack.c.bf16 %v28_v5, %v27_v2  ;;  %153 = vmatprep.mubr.msk.f32.mxu0 %vm29_vm0, %v23_v6  ;;  %v138_v15 = vld [vmem:[%s223_s2] ss:$0 sm:$0xff] }
   0x4   :  { %157 = vmatprep.subr.bf16.mxu0 %v156_v4 }
   0x5   :  { %159 = vmatpush3.bf16.msra.mxu0 %v156_v4 }
   0x6   :  { %161 = vmatprep.subr.bf16.mxu0 %v160_v7 }
   0x8   :  { %v22_v9 = vld [vmem:[#allocation2 + $0x8] sm:$0xff] }
   0x9   :  { %163 = vmatpush3.bf16.msra.mxu0 %v160_v7  ;;  %v21_v10 = vld [vmem:[#allocation2] sm:$0xff] }
   0xc   :  { %154 = vmatmul.mubr.msk.f32.vlgmr.msra.gmra.mrb[0].mxu0 %vm29_vm0, %v24_v8 }
  0xdf   :  { %v155_v11 = vpop.f32.mrb[0].mxu0 }
  0xe0   :  { %v112_v12 = vadd.f32 %v155_v11, %v22_v9  ;;  %v102_v13 = vpop.f32.mrb[1].mxu0 }
  0xe1   :  { %v111_v14 = vadd.f32 %v102_v13, %v21_v10 }
  0xe2   :  { %115 = vst.msk [vmem:[#allocation2 + $0x8] sm:$0xff] %vm18_vm1, %v112_v12 }
  0xe3   :  { %114 = vst.msk [vmem:[#allocation2] sm:$0xff] %vm18_vm1, %v111_v14 }
  0xe9   :  { %v120_v16 = vld [vmem:[#allocation2 + $0x8] sm:$0xff] }
  0xea   :  { %v129_v17 = vadd.f32 %v138_v15, %v120_v16  ;;  %v119_v18 = vld [vmem:[#allocation2] sm:$0xff] }
  0xeb   :  { %v128_v19 = vadd.f32 %v138_v15, %v119_v18 }
  0xec   :  { %131 = vst.msk [vmem:[%s224_s3 + $0x8] sm:$0xff] %vm18_vm1, %v129_v17 }
  0xed   :  { %130 = vst.msk [vmem:[%s224_s3] sm:$0xff] %vm18_vm1, %v128_v19 }

// kernel: decoder_layer.16
= control target key start
LH: loop header
LB: loop body
LE: loop exit
PB: predicated region body
PF: predicated region fallthrough
CT: control target
= control target key end

     0   :  { %vm28_vm0 = vcmask 261120   ;;  %s231_s1 = inlined_call_operand.vmem [shape: f32[32,128], index: 1, kind: input, shape index: {}]   ;;  %s232_s0 = inlined_call_operand.vmem [shape: f32[16,32], index: 0, kind: input, shape index: {}]   ;;  %s233_s2 = inlined_call_operand.vmem [shape: f32[1,128], index: 2, kind: input, shape index: {}]   ;;  %s234_s3 = inlined_call_operand.vmem [shape: f32[16,128], index: 3, kind: output, shape index: {}]  }
   0x1   :  { %v24_v0 = vld [vmem:[%s231_s1] sm:$0xff]  ;;  %v25_v1 = vld [vmem:[%s231_s1 + $0x8] sm:$0xff]  ;;  %v26_v2 = vld [vmem:[%s231_s1 + $0x10] sm:$0xff] }
   0x2   :  { %v172_v3 = vpack.c.bf16 %v25_v1, %v24_v0  ;;  %v27_v4 = vld [vmem:[%s231_s1 + $0x18] sm:$0xff]  ;;  %v22_v5 = vld [vmem:[%s232_s0] sm:$0xff]  ;;  %v23_v7 = vld [vmem:[%s232_s0 + $0x8] sm:$0xff] }
   0x3   :  { %v176_v6 = vpack.c.bf16 %v27_v4, %v26_v2  ;;  %169 = vmatprep.mubr.msk.f32.mxu0 %vm28_vm0, %v22_v5  ;;  %v154_v8 = vld [vmem:[%s233_s2] ss:$0 sm:$0xff] }
   0x4   :  { %173 = vmatprep.subr.bf16.mxu0 %v172_v3 }
   0x5   :  { %175 = vmatpush3.bf16.msra.mxu0 %v172_v3 }
   0x6   :  { %177 = vmatprep.subr.bf16.mxu0 %v176_v6 }
   0x9   :  { %179 = vmatpush3.bf16.msra.mxu0 %v176_v6 }
   0xc   :  { %170 = vmatmul.mubr.msk.f32.vlgmr.msra.gmra.mrb[0].mxu0 %vm28_vm0, %v23_v7 }
  0xdf   :  { %v171_v9 = vpop.f32.mrb[0].mxu0 }
  0xe0   :  { %v127_v10 = vadd.f32 %v171_v9, %v154_v8  ;;  %v101_v11 = vpop.f32.mrb[1].mxu0 }
  0xe1   :  { %v126_v12 = vadd.f32 %v154_v8, %v101_v11 }
  0xe2   :  { %v131_v13 = vmul.f32 0.044715, %v127_v10  ;;  %v129_v25 = vmul.f32 0.5, %v127_v10 }
  0xe3   :  { %v130_v14 = vmul.f32 0.044715, %v126_v12  ;;  %v128_v27 = vmul.f32 0.5, %v126_v12 }
  0xe4   :  { %v133_v15 = vmul.f32 %v131_v13, %v127_v10 }
  0xe5   :  { %v132_v16 = vmul.f32 %v130_v14, %v126_v12 }
  0xe6   :  { %v135_v17 = vmul.f32 %v133_v15, %v127_v10 }
  0xe7   :  { %v134_v18 = vmul.f32 %v132_v16, %v126_v12 }
  0xe8   :  { %v137_v19 = vadd.f32 %v135_v17, %v127_v10 }
  0xe9   :  { %v136_v20 = vadd.f32 %v134_v18, %v126_v12 }
  0xea   :  { %v139_v21 = vmul.f32 0.7978846, %v137_v19 }
  0xeb   :  { %v138_v22 = vmul.f32 0.7978846, %v136_v20 }
  0xec   :  { %180 = vtanh.f32 %v139_v21 }
  0xed   :  { %182 = vtanh.f32 %v138_v22 }
  0xf6   :  { %v181_v23 = vpop.eup %180 }
  0xf7   :  { %v183_v24 = vpop.eup %182  ;;  %v143_v26 = vadd.f32 1.0, %v181_v23 }
  0xf8   :  { %v142_v28 = vadd.f32 1.0, %v183_v24 }
  0xf9   :  { %v145_v29 = vmul.f32 %v143_v26, %v129_v25 }
  0xfa   :  { %v144_v30 = vmul.f32 %v142_v28, %v128_v27 }
  0xfb   :  { %147 = vst [vmem:[%s234_s3 + $0x8] sm:$0xff] %v145_v29 }
  0xfc   :  { %146 = vst [vmem:[%s234_s3] sm:$0xff] %v144_v30 }

// kernel: decoder_layer.17
= control target key start
LH: loop header
LB: loop body
LE: loop exit
PB: predicated region body
PF: predicated region fallthrough
CT: control target
= control target key end

     0   :  { %vm28_vm0 = vcmask 261120   ;;  %v332_v5 = vmov 0.0   ;;  %s462_s0 = inlined_call_operand.vmem [shape: f32[16,128], index: 0, kind: input, shape index: {}]   ;;  %s463_s1 = inlined_call_operand.vmem [shape: f32[128,32], index: 1, kind: input, shape index: {}]   ;;  %s464_s2 = inlined_call_operand.vmem [shape: f32[1,32], index: 2, kind: input, shape index: {}]   ;;  %s465_s3 = inlined_call_operand.vmem [shape: f32[16,32], index: 3, kind: input, shape index: {}]   ;;  %s466_s4 = inlined_call_operand.vmem [shape: f32[1,32], index: 4, kind: input, shape index: {}]   ;;  %s467_s5 = inlined_call_operand.vmem [shape: f32[1,32], index: 5, kind: input, shape index: {}]   ;;  %s468_s6 = inlined_call_operand.hbm [shape: f32[16,32], index: 6, kind: output, shape index: {}]  }
   0x1   :  { %v35_v0 = vld [vmem:[%s463_s1] sm:$0xff]  ;;  %v36_v1 = vld [vmem:[%s463_s1 + $0x8] sm:$0xff]  ;;  %v37_v2 = vld [vmem:[%s463_s1 + $0x10] sm:$0xff]  ;;  %30 = vst.msk [vmem:[#allocation2 + $0x8] sm:$0xff] %vm28_vm0, %v332_v5 }
   0x2   :  { %v268_v3 = vpack.c.bf16 %v36_v1, %v35_v0  ;;  %v38_v4 = vld [vmem:[%s463_s1 + $0x18] sm:$0xff]  ;;  %29 = vst.msk [vmem:[#allocation2] sm:$0xff] %vm28_vm0, %v332_v5  ;;  %v39_v7 = vld [vmem:[%s463_s1 + $0x20] sm:$0xff]  ;;  %v40_v8 = vld [vmem:[%s463_s1 + $0x28] sm:$0xff] }
   0x3   :  { %v272_v6 = vpack.c.bf16 %v38_v4, %v37_v2  ;;  %v276_v9 = vpack.c.bf16 %v40_v8, %v39_v7  ;;  %v33_v10 = vld [vmem:[%s462_s0] sm:$0xff]  ;;  %v41_v11 = vld [vmem:[%s463_s1 + $0x30] sm:$0xff]  ;;  %v42_v12 = vld [vmem:[%s463_s1 + $0x38] sm:$0xff] }
   0x4   :  { %269 = vmatprep.subr.bf16.mxu0 %v268_v3  ;;  %265 = vmatprep.mubr.f32.mxu0 %v33_v10 }
   0x5   :  { %271 = vmatpush3.bf16.msra.mxu0 %v268_v3 }
   0x6   :  { %273 = vmatprep.subr.bf16.mxu0 %v272_v6 }
   0x7   :  { %11 = vsyncpa [#allocation4], 0  ;;  %v280_v13 = vpack.c.bf16 %v42_v12, %v41_v11  ;;  %v43_v14 = vld [vmem:[%s463_s1 + $0x40] sm:$0xff]  ;;  %v44_v15 = vld [vmem:[%s463_s1 + $0x48] sm:$0xff]  ;;  %s333_s15 = smov [#allocation3]  }
   0x8   :  { %v284_v16 = vpack.c.bf16 %v44_v15, %v43_v14  ;;  %v45_v17 = vld [vmem:[%s463_s1 + $0x50] sm:$0xff]  ;;  %v46_v18 = vld [vmem:[%s463_s1 + $0x58] sm:$0xff]  ;;  %v47_v20 = vld [vmem:[%s463_s1 + $0x60] sm:$0xff]  ;;  %s201_s16 = sshll.u32 %s333_s15, 4  ;;  %s202_s16 = int_to_ptr.vmem [resolvable:$true] %s201_s16 }
   0x9   :  { %275 = vmatpush3.bf16.msra.mxu0 %v272_v6  ;;  %v288_v19 = vpack.c.bf16 %v46_v18, %v45_v17  ;;  %v48_v21 = vld [vmem:[%s463_s1 + $0x68] sm:$0xff]  ;;  %v49_v23 = vld [vmem:[%s463_s1 + $0x70] sm:$0xff]  ;;  %v50_v24 = vld [vmem:[%s463_s1 + $0x78] sm:$0xff]  ;;  %s308_s17 = scalar_lea.vmem %s202_s16, 256  ;;  %p313_p1 = scmp.lt.s32.totalorder %s202_s16, %s202_s16 }
   0xa   :  { %277 = vmatprep.subr.bf16.mxu0 %v276_v9  ;;  %v292_v22 = vpack.c.bf16 %v48_v21, %v47_v20  ;;  %v296_v25 = vpack.c.bf16 %v50_v24, %v49_v23  ;;  %v34_v26 = vld [vmem:[%s462_s0 + $0x8] sm:$0xff]  ;;  %v31_v28 = vld [vmem:[#allocation2] sm:$0xff]  ;;  %p309_p0 = scmp.ne.s32.totalorder %s202_s16, %s308_s17  ;;  %p314_p2 = scmp.lt.s32.totalorder %s308_s17, %s308_s17 }
   0xb   :  { %v32_v27 = vld [vmem:[#allocation2 + $0x8] sm:$0xff]  ;;  %v212_v33 = vld [vmem:[%s464_s2] ss:$0 sm:$0xff] }
   0xc   :  { %v145_v36 = vld [vmem:[%s465_s3] sm:$0xff]  ;;  %v146_v39 = vld [vmem:[%s465_s3 + $0x8] sm:$0xff]  ;;  %p315_p3 = por %p314_p2, %p313_p1 }
   0xd   :  { %279 = vmatpush3.bf16.msra.mxu0 %v276_v9  ;;  %v213_v61 = vld [vmem:[%s466_s4] ss:$0 sm:$0xff] }
   0xe   :  { %281 = vmatprep.subr.bf16.mxu0 %v280_v13  ;;  %v214_v63 = vld [vmem:[%s467_s5] ss:$0 sm:$0xff]  ;;  %p316_p4 = pnand %p315_p3, %p309_p0 }
  0x11   :  { %283 = vmatpush3.bf16.msra.mxu0 %v280_v13 }
  0x12   :  { %285 = vmatprep.subr.bf16.mxu0 %v284_v16 }
  0x15   :  { %287 = vmatpush3.bf16.msra.mxu0 %v284_v16 }
  0x16   :  { %289 = vmatprep.subr.bf16.mxu0 %v288_v19 }
  0x19   :  { %291 = vmatpush3.bf16.msra.mxu0 %v288_v19 }
  0x1a   :  { %293 = vmatprep.subr.bf16.mxu0 %v292_v22 }
  0x1d   :  { %295 = vmatpush3.bf16.msra.mxu0 %v292_v22 }
  0x1e   :  { %297 = vmatprep.subr.bf16.mxu0 %v296_v25 }
  0x21   :  { %299 = vmatpush3.bf16.msra.mxu0 %v296_v25 }
  0x24   :  { %266 = vmatmul.mubr.f32.vlgmr.msra.gmra.mrb[0].mxu0 %v34_v26 }
  0xf7   :  { %v267_v29 = vpop.f32.mrb[0].mxu0 }
  0xf8   :  { %v127_v30 = vadd.f32 %v267_v29, %v32_v27  ;;  %v117_v31 = vpop.f32.mrb[1].mxu0 }
  0xf9   :  { %v126_v32 = vadd.f32 %v117_v31, %v31_v28 }
  0xfa   :  { %130 = vst.msk [vmem:[#allocation2 + $0x8] sm:$0xff] %vm28_vm0, %v127_v30 }
  0xfb   :  { %129 = vst.msk [vmem:[#allocation2] sm:$0xff] %vm28_vm0, %v126_v32 }
 0x101   :  { %v135_v34 = vld [vmem:[#allocation2 + $0x8] sm:$0xff] }
 0x102   :  { %v134_v35 = vld [vmem:[#allocation2] sm:$0xff]  ;;  %v144_v38 = vadd.f32 %v212_v33, %v135_v34 }
 0x103   :  { %v143_v37 = vadd.f32 %v212_v33, %v134_v35 }
 0x104   :  { %v148_v42 = vadd.f32 %v146_v39, %v144_v38 }
 0x105   :  { %v147_v40 = vadd.f32 %v145_v36, %v143_v37 }
 0x106   :  { %v152_v43 = vsel %vm28_vm0, %v148_v42, 0.0 }
 0x107   :  { %v149_v41 = vsel %vm28_vm0, %v147_v40, 0.0 }
 0x108   :  { %150 = vadd.xlane.f32.xlu0 %v149_v41 }
 0x10c   :  { %153 = vadd.xlane.f32.xlu0 %v152_v43 }
 0x195   :  { %v151_v44 = vpop.xlane.xlu0 %150 }
 0x196   :  { %v156_v45 = vmul.f32 0.03125, %v151_v44 }
 0x198   :  { %v158_v46 = vsub.f32 %v147_v40, %v156_v45 }
 0x199   :  { %v154_v47 = vpop.xlane.xlu0 %153 }
 0x19a   :  { %v157_v48 = vmul.f32 0.03125, %v154_v47  ;;  %v160_v49 = vmul.f32 %v158_v46, %v158_v46 }
 0x19c   :  { %v159_v50 = vsub.f32 %v148_v42, %v157_v48  ;;  %v162_v51 = vsel %vm28_vm0, %v160_v49, 0.0 }
 0x19d   :  { %163 = vadd.xlane.f32.xlu1 %v162_v51 }
 0x19e   :  { %v161_v52 = vmul.f32 %v159_v50, %v159_v50 }
 0x1a0   :  { %v165_v53 = vsel %vm28_vm0, %v161_v52, 0.0 }
 0x1a1   :  { %166 = vadd.xlane.f32.xlu1 %v165_v53 }
 0x22a   :  { %v164_v54 = vpop.xlane.xlu1 %163 }
 0x22b   :  { %v168_v55 = vmul.f32 0.03125, %v164_v54 }
 0x22d   :  { %v170_v56 = vadd.f32 1e-05, %v168_v55 }
 0x22e   :  { %v167_v57 = vpop.xlane.xlu1 %166 }
 0x22f   :  { %304 = vrsqrt.f32 %v170_v56  ;;  %v169_v58 = vmul.f32 0.03125, %v167_v57 }
 0x231   :  { %v171_v59 = vadd.f32 1e-05, %v169_v58 }
 0x233   :  { %306 = vrsqrt.f32 %v171_v59 }
 0x239   :  { %v305_v60 = vpop.eup %304 }
 0x23a   :  { %v174_v62 = vmul.f32 %v305_v60, %v158_v46 }
 0x23c   :  { %v183_v0 = vmul.f32 %v213_v61, %v174_v62 }
 0x23d   :  { %v307_v1 = vpop.eup %306 }
 0x23e   :  { %v175_v2 = vmul.f32 %v307_v1, %v159_v50  ;;  %v192_v3 = vadd.f32 %v214_v63, %v183_v0 }
 0x240   :  { %v184_v4 = vmul.f32 %v213_v61, %v175_v2  ;;  %194 = vst.msk [vmem:[#allocation3] sm:$0xff] %vm28_vm0, %v192_v3 }
 0x242   :  { %v193_v5 = vadd.f32 %v214_v63, %v184_v4 }
 0x244   :  { %195 = vst.msk [vmem:[#allocation3 + $0x8] sm:$0xff] %vm28_vm0, %v193_v5 }
 0x245   :  { %319 = shalt.err (!%p316_p4)
}
 0x246   :  { %s320_s18 = scalar_lea.hbm %s468_s6, 256 }
 0x247   :  { %p321_p5 = scmp.ne.s32.totalorder %s468_s6, %s320_s18  ;;  %p324_p6 = scmp.lt.u32.totalorder %s320_s18, %s468_s6 }
 0x249   :  { %p326_p7 = pnand %p324_p6, %p321_p5 }
 0x24b   :  { %329 = shalt.err (!%p326_p7)
}
 0x24c   :  { %s334_s23 = smov 128   ;;  %s335_s24 = smov 8  }
 0x24d   :  { %207 = dma.vmem_to_hbm [thread:$0]  %s202_s16, 256, %s468_s6, [#allocation4], %s334_s23, %s334_s23, %s335_s24  }
 0x24e   :  { %330 = dma.done.wait [#allocation4], 256  }
 0x24f   :  { %331 = vsyncadd [#allocation4], 4294967040 }
 0x250   :  { %211 = vsyncpa [#allocation4], 1 }

// kernel: decoder_layer.14
= control target key start
LH: loop header
LB: loop body
LE: loop exit
PB: predicated region body
PF: predicated region fallthrough
CT: control target
= control target key end

     0   :  { %s1385_s12 = smov 0   ;;  %s1387_s13 = smov 0   ;;  %s1534_s0 = inlined_call_operand.vmem [shape: f32[2,4,8,8], index: 0, kind: input, shape index: {}]   ;;  %s1535_s1 = inlined_call_operand.vmem [shape: f32[2,4,8,8], index: 1, kind: input, shape index: {}]   ;;  %s1536_s2 = inlined_call_operand.vmem [shape: f32[2,4,8,8], index: 2, kind: input, shape index: {}]   ;;  %s1537_s3 = inlined_call_operand.vmem [shape: f32[2,4,8,8], index: 3, kind: output, shape index: {}]  }
   0x1   :  { %s1389_s14 = smov 0  }
   0x2 LB: > { %s32_s15 = sadd.s32 1, %s1355_s13  ;;  %p1200_p0 = scmp.ge.s32.totalorder %s1359_s14, 1  ;;  %s1359_s14 = sphi %s1389_s14, %s13_s14   ;;  %s1355_s13 = sphi %s1387_s13, %s1539_s13   ;;  %s1351_s12 = sphi %s1385_s12, %s1538_s12  }
   0x3   : > { %p34_p1 = scmp.ge.s32.totalorder %s32_s15, 2  ;;  %p193_p2 = scmp.lt.s32.totalorder %s1359_s14, 3 }
   0x5   : > { %s1541_s15 = smov (%p34_p1, %s32_s15), 0  ;;  %p194_p3 = pnand %p1200_p0, %p193_p2 }
   0x6   : > { %p239_p4 = scmp.lt.s32.totalorder (!%p194_p3), %s1351_s12, 1  ;;  %vm284_vm0 = vcmask (!%p194_p3), 64512   ;;  %v1361_v0 = vmov (!%p194_p3), 0.0   ;;  %vm1362_vm1 = vmmov (!%p194_p3), 0   ;;  %vm275_vm2 = vcmask (!%p194_p3), 7168  }
   0x7   : > { %197 = sbr.rel (%p194_p3) target bundleno = 828 (0x33c), region = 32  ;;  %1243 = vmatprep.subr.mxu0 (!%p194_p3), %v1361_v0  ;;  %285 = vst.msk [vmem:[#allocation4] sm:$0xff] (!%p194_p3), %vm284_vm0, %v1361_v0  ;;  %286 = vst.msk [vmem:[#allocation4 + $0x8] sm:$0xff] (!%p194_p3), %vm284_vm0, %v1361_v0  ;;  %1245 = vmatprep.mubr.msk.f32.mxu0 (!%p194_p3), %vm1362_vm1, %v1361_v0  ;;  %v1363_v9 = vmov (!%p194_p3), -1e+30   ;;  %v1364_v22 = vmov (!%p194_p3), 0  }
   0x8   : > { %287 = vst.msk [vmem:[#allocation4 + $0x10] sm:$0xff] (!%p194_p3), %vm284_vm0, %v1361_v0  ;;  %288 = vst.msk [vmem:[#allocation4 + $0x18] sm:$0xff] (!%p194_p3), %vm284_vm0, %v1361_v0  ;;  %1248 = vmatprep.subr.mxu1 (!%p194_p3), %v1361_v0  ;;  %1250 = vmatprep.mubr.msk.f32.mxu1 (!%p194_p3), %vm1362_vm1, %v1361_v0 }
   0x9   : > { %276 = vst.msk [vmem:[#allocation2] sm:$0xff] (!%p194_p3), %vm275_vm2, %v1363_v9  ;;  %277 = vst.msk [vmem:[#allocation2 + $0x8] sm:$0xff] (!%p194_p3), %vm275_vm2, %v1363_v9  ;;  %1311 = vset.pattern.permute.xlu0 (!%p194_p3), %v1364_v22  ;;  %1312 = vset.pattern.permute.xlu1 (!%p194_p3), %v1364_v22 }
   0xa   : > { %278 = vst.msk [vmem:[#allocation2 + $0x10] sm:$0xff] (!%p194_p3), %vm275_vm2, %v1363_v9  ;;  %279 = vst.msk [vmem:[#allocation2 + $0x18] sm:$0xff] (!%p194_p3), %vm275_vm2, %v1363_v9 }
   0xb   : > { %280 = vst.msk [vmem:[#allocation3] sm:$0xff] (!%p194_p3), %vm275_vm2, %v1361_v0  ;;  %281 = vst.msk [vmem:[#allocation3 + $0x8] sm:$0xff] (!%p194_p3), %vm275_vm2, %v1361_v0 }
   0xc   : > { %282 = vst.msk [vmem:[#allocation3 + $0x10] sm:$0xff] (!%p194_p3), %vm275_vm2, %v1361_v0  ;;  %283 = vst.msk [vmem:[#allocation3 + $0x18] sm:$0xff] (!%p194_p3), %vm275_vm2, %v1361_v0 }
   0xe   : > { %s1543_s12 = smov (!%p239_p4, %s1351_s12), 1 }
   0xf   : > { %s1417_s16 = sshll.u32 %s1543_s12, 5 }
  0x10   : > { %s254_s19 = scalar_lea.vmem %s1535_s1, %s1417_s16  ;;  %s246_s22 = scalar_lea.vmem %s1534_s0, %s1417_s16  ;;  %v1463_v23 = vld [vmem:[#allocation2] sm:$0xff]  ;;  %v1468_v26 = vld [vmem:[#allocation2 + $0x8] sm:$0xff] }
  0x11   : > { %v293_v1 = vld [vmem:[%s254_s19] sm:$0xff]  ;;  %v294_v2 = vld [vmem:[%s254_s19 + $0x8] sm:$0xff]  ;;  %v295_v5 = vld [vmem:[%s254_s19 + $0x10] sm:$0xff]  ;;  %s262_s25 = scalar_lea.vmem %s1536_s2, %s1417_s16  ;;  %s270_s28 = scalar_lea.vmem %s1537_s3, %s1417_s16 }
  0x12   : > { %1244 = vmatpush3.xpose.msk.msra.mxu0 %vm284_vm0, %v293_v1  ;;  %v289_v3 = vld [vmem:[%s246_s22] sm:$0xff]  ;;  %1249 = vmatpush3.xpose.msk.msra.mxu1 %vm284_vm0, %v294_v2  ;;  %v290_v4 = vld [vmem:[%s246_s22 + $0x8] sm:$0xff]  ;;  %v296_v6 = vld [vmem:[%s254_s19 + $0x18] sm:$0xff] }
  0x13   : > { %1253 = vmatprep.subr.mxu0 %v1361_v0  ;;  %1258 = vmatprep.subr.mxu1 %v1361_v0  ;;  %v291_v7 = vld [vmem:[%s246_s22 + $0x10] sm:$0xff]  ;;  %v292_v8 = vld [vmem:[%s246_s22 + $0x18] sm:$0xff]  ;;  %v297_v39 = vld [vmem:[%s262_s25] sm:$0xff] }
  0x14   : > { %v1470_v27 = vld [vmem:[#allocation2 + $0x10] sm:$0xff]  ;;  %v1479_v33 = vld [vmem:[#allocation2 + $0x18] sm:$0xff]  ;;  %v298_v40 = vld [vmem:[%s262_s25 + $0x8] sm:$0xff] }
  0x15   : > { %1246 = vmatmul.mubr.msk.f32.vlgmr.msra.gmra.mrb[0].mxu0 %vm284_vm0, %v289_v3  ;;  %1251 = vmatmul.mubr.msk.f32.vlgmr.msra.gmra.mrb[0].mxu1 %vm284_vm0, %v290_v4  ;;  %v299_v52 = vld [vmem:[%s262_s25 + $0x10] sm:$0xff]  ;;  %v300_v56 = vld [vmem:[%s262_s25 + $0x18] sm:$0xff] }
  0x16   : > { %1254 = vmatpush3.xpose.msk.msra.mxu0 %vm284_vm0, %v295_v5  ;;  %1255 = vmatprep.mubr.msk.f32.mxu0 %vm1362_vm1, %v1361_v0 }
  0x17   : > { %1259 = vmatpush3.xpose.msk.msra.mxu1 %vm284_vm0, %v296_v6  ;;  %1260 = vmatprep.mubr.msk.f32.mxu1 %vm1362_vm1, %v1361_v0 }
  0x18   : > { %1263 = vmatprep.subr.mxu0 %v1361_v0  ;;  %1268 = vmatprep.subr.mxu1 %v1361_v0 }
  0x19   : > { %1256 = vmatmul.mubr.msk.f32.vlgmr.msra.gmra.mrb[2].mxu0 %vm284_vm0, %v291_v7  ;;  %v670_v7 = vld [vmem:[#allocation3] sm:$0xff] }
  0x1a   : > { %1261 = vmatmul.mubr.msk.f32.vlgmr.msra.gmra.mrb[2].mxu1 %vm284_vm0, %v292_v8  ;;  %1265 = vmatprep.mubr.msk.f32.mxu0 %vm1362_vm1, %v1361_v0 }
  0x1b   : > { %1270 = vmatprep.mubr.msk.f32.mxu1 %vm1362_vm1, %v1361_v0  ;;  %1264 = vmatpush3.msra.mxu0 %v297_v39 }
  0x1c   : > { %1273 = vmatprep.subr.mxu0 %v1361_v0  ;;  %1269 = vmatpush3.msra.mxu1 %v298_v40 }
  0x1d   : > { %1278 = vmatprep.subr.mxu1 %v1361_v0 }
  0xe8   : > { %v374_v10 = vpop.f32.mrb[0].mxu0  ;;  %v450_v11 = vpop.f32.mrb[0].mxu1 }
  0xe9   : > { %v1247_v12 = vpop.f32.mrb[1].mxu0  ;;  %v610_v13 = vsel %vm284_vm0, %v374_v10, -inf  ;;  %v1252_v14 = vpop.f32.mrb[1].mxu1  ;;  %v613_v15 = vsel %vm284_vm0, %v450_v11, -inf }
  0xea   : > { %611 = vmax.xlane.f32.xlu0 %v610_v13  ;;  %v672_v14 = vld [vmem:[#allocation3 + $0x10] sm:$0xff] }
  0xec   : > { %v526_v16 = vpop.f32.mrb[2].mxu0 }
  0xed   : > { %v1257_v17 = vpop.f32.mrb[3].mxu0  ;;  %v616_v18 = vsel %vm284_vm0, %v526_v16, -inf  ;;  %v602_v19 = vpop.f32.mrb[2].mxu1 }
  0xee   : > { %614 = vmax.xlane.f32.xlu0 %v613_v15  ;;  %617 = vmax.xlane.f32.xlu1 %v616_v18  ;;  %v1262_v20 = vpop.f32.mrb[3].mxu1  ;;  %v619_v21 = vsel %vm284_vm0, %v602_v19, -inf  ;;  %v673_v18 = vld [vmem:[#allocation3 + $0x18] sm:$0xff] }
  0xf2   : > { %620 = vmax.xlane.f32.xlu1 %v619_v21 }
 0x177   : > { %v612_v24 = vpop.xlane.xlu0 %611 }
 0x178   : > { %v1466_v25 = vmax.f32 %v1463_v23, %v612_v24 }
 0x17a   : > { %v626_v28 = vsub.f32 %v1463_v23, %v1466_v25  ;;  %1027 = vst.msk [vmem:[#allocation2] sm:$0xff] %vm275_vm2, %v1466_v25  ;;  %640 = vperm.xlu0 %1311, %v1466_v25  }
 0x17b   : > { %v615_v29 = vpop.xlane.xlu0 %614  ;;  %v618_v30 = vpop.xlane.xlu1 %617 }
 0x17c   : > { %v623_v31 = vmax.f32 %v1468_v26, %v615_v29  ;;  %v624_v32 = vmax.f32 %v1470_v27, %v618_v30  ;;  %v630_v1 = vmul.f32 1.442695, %v626_v28 }
 0x17e   : > { %v627_v34 = vsub.f32 %v1468_v26, %v623_v31  ;;  %1028 = vst.msk [vmem:[#allocation2 + $0x8] sm:$0xff] %vm275_vm2, %v623_v31  ;;  %645 = vperm.xlu1 %1312, %v623_v31   ;;  %v628_v35 = vsub.f32 %v1470_v27, %v624_v32  ;;  %1029 = vst.msk [vmem:[#allocation2 + $0x10] sm:$0xff] %vm275_vm2, %v624_v32  ;;  %v699_v31 = vld [vmem:[#allocation4] sm:$0xff] }
 0x17f   : > { %v621_v36 = vpop.xlane.xlu1 %620 }
 0x180   : > { %v625_v37 = vmax.f32 %v1479_v33, %v621_v36  ;;  %v632_v62 = vmul.f32 1.442695, %v627_v34  ;;  %v700_v34 = vld [vmem:[#allocation4 + $0x8] sm:$0xff] }
 0x182   : > { %650 = vperm.xlu1 %1312, %v624_v32   ;;  %v629_v38 = vsub.f32 %v1479_v33, %v625_v37  ;;  %1030 = vst.msk [vmem:[#allocation2 + $0x18] sm:$0xff] %vm275_vm2, %v625_v37 }
 0x184   : > { %v636_v2 = vmul.f32 1.442695, %v629_v38 }
 0x186   : > { %655 = vperm.xlu1 %1312, %v625_v37  }
 0x1f9   : > { %v641_v41 = vpop.permute.xlu0 %640 }
 0x1fa   : > { %v658_v42 = vsub.f32 %v374_v10, %v641_v41  ;;  %v671_v10 = vld [vmem:[#allocation3 + $0x8] sm:$0xff]  ;;  %v701_v41 = vld [vmem:[#allocation4 + $0x10] sm:$0xff] }
 0x1fc   : > { %v662_v43 = vmul.f32 1.442695, %v658_v42 }
 0x1fd   : > { %v646_v44 = vpop.permute.xlu1 %645 }
 0x1fe   : > { %1313 = vpow2.f32 %v662_v43  ;;  %v659_v45 = vsub.f32 %v450_v11, %v646_v44 }
 0x200   : > { %v664_v46 = vmul.f32 1.442695, %v659_v45 }
 0x201   : > { %v651_v47 = vpop.permute.xlu1 %650 }
 0x202   : > { %1315 = vpow2.f32 %v664_v46  ;;  %v660_v48 = vsub.f32 %v526_v16, %v651_v47  ;;  %v702_v46 = vld [vmem:[#allocation4 + $0x18] sm:$0xff] }
 0x204   : > { %v666_v49 = vmul.f32 1.442695, %v660_v48 }
 0x205   : > { %v656_v50 = vpop.permute.xlu1 %655 }
 0x206   : > { %1317 = vpow2.f32 %v666_v49  ;;  %v661_v51 = vsub.f32 %v602_v19, %v656_v50 }
 0x208   : > { %v1314_v53 = vpop.eup %1313  ;;  %v668_v54 = vmul.f32 1.442695, %v661_v51 }
 0x209   : > { %1266 = vmatmul.mubr.msk.f32.vlgmr.msra.gmra.mrb[4].mxu0 %vm284_vm0, %v1314_v53  ;;  %v678_v55 = vsel %vm284_vm0, %v1314_v53, 0.0 }
 0x20a   : > { %1319 = vpow2.f32 %v668_v54  ;;  %679 = vadd.xlane.f32.xlu1 %v678_v55  ;;  %1274 = vmatpush3.msra.mxu0 %v299_v52 }
 0x20b   : > { %1275 = vmatprep.mubr.msk.f32.mxu0 %vm1362_vm1, %v1361_v0  ;;  %1321 = vpow2.f32 %v632_v62 }
 0x20c   : > { %v1316_v57 = vpop.eup %1315  ;;  %1323 = vpow2.f32 %v630_v1 }
 0x20d   : > { %1271 = vmatmul.mubr.msk.f32.vlgmr.msra.gmra.mrb[4].mxu1 %vm284_vm0, %v1316_v57  ;;  %v681_v58 = vsel %vm284_vm0, %v1316_v57, 0.0 }
 0x20e   : > { %682 = vadd.xlane.f32.xlu0 %v681_v58  ;;  %1279 = vmatpush3.msra.mxu1 %v300_v56 }
 0x20f   : > { %1280 = vmatprep.mubr.msk.f32.mxu1 %vm1362_vm1, %v1361_v0  ;;  %v634_v0 = vmul.f32 1.442695, %v628_v35 }
 0x210   : > { %v1318_v59 = vpop.eup %1317 }
 0x211   : > { %1276 = vmatmul.mubr.msk.f32.vlgmr.msra.gmra.mrb[6].mxu0 %vm284_vm0, %v1318_v59  ;;  %v684_v60 = vsel %vm284_vm0, %v1318_v59, 0.0  ;;  %1325 = vpow2.f32 %v634_v0 }
 0x212   : > { %685 = vadd.xlane.f32.xlu1 %v684_v60  ;;  %1327 = vpow2.f32 %v636_v2 }
 0x214   : > { %v1320_v61 = vpop.eup %1319 }
 0x215   : > { %1281 = vmatmul.mubr.msk.f32.vlgmr.msra.gmra.mrb[6].mxu1 %vm284_vm0, %v1320_v61  ;;  %v687_v63 = vsel %vm284_vm0, %v1320_v61, 0.0  ;;  %v1322_v3 = vpop.eup %1321 }
 0x216   : > { %688 = vadd.xlane.f32.xlu1 %v687_v63  ;;  %v1324_v4 = vpop.eup %1323  ;;  %v675_v12 = vmul.f32 %v1322_v3, %v671_v10 }
 0x217   : > { %v674_v8 = vmul.f32 %v1324_v4, %v670_v7 }
 0x21b   : > { %v1326_v5 = vpop.eup %1325 }
 0x21c   : > { %v1328_v6 = vpop.eup %1327  ;;  %v676_v16 = vmul.f32 %v1326_v5, %v672_v14 }
 0x21d   : > { %v677_v21 = vmul.f32 %v1328_v6, %v673_v18 }
 0x224   : > { %710 = vperm.xlu0 %1311, %v1322_v3  }
 0x227   : > { %705 = vperm.xlu1 %1312, %v1324_v4  }
 0x22b   : > { %715 = vperm.xlu1 %1312, %v1326_v5  }
 0x22f   : > { %720 = vperm.xlu1 %1312, %v1328_v6  }
 0x297   : > { %v680_v9 = vpop.xlane.xlu1 %679 }
 0x298   : > { %v690_v11 = vadd.f32 %v680_v9, %v674_v8 }
 0x29a   : > { %695 = vst.msk [vmem:[#allocation3] sm:$0xff] %vm275_vm2, %v690_v11 }
 0x29b   : > { %v683_v13 = vpop.xlane.xlu0 %682 }
 0x29c   : > { %v691_v15 = vadd.f32 %v683_v13, %v675_v12 }
 0x29e   : > { %696 = vst.msk [vmem:[#allocation3 + $0x8] sm:$0xff] %vm275_vm2, %v691_v15 }
 0x29f   : > { %v686_v17 = vpop.xlane.xlu1 %685 }
 0x2a0   : > { %v692_v19 = vadd.f32 %v686_v17, %v676_v16 }
 0x2a1   : > { %v1034_v20 = vld [vmem:[#allocation3] sm:$0xff] }
 0x2a2   : > { %697 = vst.msk [vmem:[#allocation3 + $0x10] sm:$0xff] %vm275_vm2, %v692_v19  ;;  %1329 = vrcp.f32 %v1034_v20 }
 0x2a3   : > { %v689_v22 = vpop.xlane.xlu1 %688  ;;  %v711_v35 = vpop.permute.xlu0 %710 }
 0x2a4   : > { %v693_v23 = vadd.f32 %v689_v22, %v677_v21  ;;  %v724_v40 = vmul.f32 %v711_v35, %v700_v34 }
 0x2a5   : > { %v1035_v24 = vld [vmem:[#allocation3 + $0x8] sm:$0xff] }
 0x2a6   : > { %698 = vst.msk [vmem:[#allocation3 + $0x18] sm:$0xff] %vm275_vm2, %v693_v23  ;;  %1331 = vrcp.f32 %v1035_v24 }
 0x2a7   : > { %v706_v32 = vpop.permute.xlu1 %705 }
 0x2a8   : > { %v723_v33 = vmul.f32 %v706_v32, %v699_v31 }
 0x2a9   : > { %v1036_v25 = vld [vmem:[#allocation3 + $0x10] sm:$0xff] }
 0x2aa   : > { %1333 = vrcp.f32 %v1036_v25 }
 0x2ab   : > { %v716_v39 = vpop.permute.xlu1 %715 }
 0x2ac   : > { %v1330_v26 = vpop.eup %1329  ;;  %v725_v45 = vmul.f32 %v716_v39, %v701_v41 }
 0x2ad   : > { %1048 = vperm.xlu1 %1312, %v1330_v26   ;;  %v1037_v27 = vld [vmem:[#allocation3 + $0x18] sm:$0xff] }
 0x2ae   : > { %1335 = vrcp.f32 %v1037_v27 }
 0x2af   : > { %v721_v47 = vpop.permute.xlu1 %720 }
 0x2b0   : > { %v1332_v28 = vpop.eup %1331  ;;  %v726_v51 = vmul.f32 %v721_v47, %v702_v46 }
 0x2b1   : > { %1053 = vperm.xlu0 %1311, %v1332_v28  }
 0x2b4   : > { %v1334_v29 = vpop.eup %1333 }
 0x2b5   : > { %1058 = vperm.xlu1 %1312, %v1334_v29  }
 0x2b8   : > { %v1336_v30 = vpop.eup %1335 }
 0x2b9   : > { %1063 = vperm.xlu0 %1311, %v1336_v30  }
 0x2dc   : > { %v796_v36 = vpop.f32.mrb[4].mxu0 }
 0x2dd   : > { %v1019_v37 = vadd.f32 %v796_v36, %v723_v33  ;;  %v1267_v38 = vpop.f32.mrb[5].mxu0 }
 0x2df   : > { %1023 = vst.msk [vmem:[#allocation4] sm:$0xff] %vm284_vm0, %v1019_v37 }
 0x2e0   : > { %v869_v42 = vpop.f32.mrb[4].mxu1 }
 0x2e1   : > { %v1020_v43 = vadd.f32 %v869_v42, %v724_v40  ;;  %v1272_v44 = vpop.f32.mrb[5].mxu1 }
 0x2e3   : > { %1024 = vst.msk [vmem:[#allocation4 + $0x8] sm:$0xff] %vm284_vm0, %v1020_v43 }
 0x2e4   : > { %v942_v48 = vpop.f32.mrb[6].mxu0 }
 0x2e5   : > { %v1021_v49 = vadd.f32 %v942_v48, %v725_v45  ;;  %v1277_v50 = vpop.f32.mrb[7].mxu0 }
 0x2e6   : > { %v1042_v56 = vld [vmem:[#allocation4] sm:$0xff] }
 0x2e7   : > { %1025 = vst.msk [vmem:[#allocation4 + $0x10] sm:$0xff] %vm284_vm0, %v1021_v49 }
 0x2e8   : > { %v1015_v52 = vpop.f32.mrb[6].mxu1 }
 0x2e9   : > { %v1022_v53 = vadd.f32 %v1015_v52, %v726_v51  ;;  %v1282_v54 = vpop.f32.mrb[7].mxu1 }
 0x2ea   : > { %v1043_v58 = vld [vmem:[#allocation4 + $0x8] sm:$0xff] }
 0x2eb   : > { %1026 = vst.msk [vmem:[#allocation4 + $0x18] sm:$0xff] %vm284_vm0, %v1022_v53 }
 0x2ee   : > { %v1044_v62 = vld [vmem:[#allocation4 + $0x10] sm:$0xff] }
 0x2f2   : > { %v1045_v0 = vld [vmem:[#allocation4 + $0x18] sm:$0xff] }
 0x32c   : > { %v1049_v55 = vpop.permute.xlu1 %1048 }
 0x32d   : > { %v1066_v57 = vmul.f32 %v1049_v55, %v1042_v56 }
 0x32f   : > { %1070 = vst.msk [vmem:[%s270_s28] sm:$0xff] %vm284_vm0, %v1066_v57 }
 0x330   : > { %v1054_v59 = vpop.permute.xlu0 %1053 }
 0x331   : > { %v1067_v60 = vmul.f32 %v1054_v59, %v1043_v58 }
 0x333   : > { %1071 = vst.msk [vmem:[%s270_s28 + $0x8] sm:$0xff] %vm284_vm0, %v1067_v60 }
 0x334   : > { %v1059_v61 = vpop.permute.xlu1 %1058 }
 0x335   : > { %v1068_v63 = vmul.f32 %v1059_v61, %v1044_v62 }
 0x337   : > { %1072 = vst.msk [vmem:[%s270_s28 + $0x10] sm:$0xff] %vm284_vm0, %v1068_v63 }
 0x338   : > { %v1064_v1 = vpop.permute.xlu0 %1063 }
 0x339   : > { %v1069_v2 = vmul.f32 %v1064_v1, %v1045_v0 }
 0x33b   : > { %1073 = vst.msk [vmem:[%s270_s28 + $0x18] sm:$0xff] %vm284_vm0, %v1069_v2 }
 0x33c PF: > { %s13_s14 = sadd.s32 1, %s1359_s14   ;;  %s1538_s12 = smov %s1355_s13 }
 0x33d   : > { %p10_p5 = scmp.ge.s32.totalorder %s13_s14, 4   ;;  %s1539_s13 = smov %s1541_s15 }
 0x33f   :  { %12 = sbr.rel (!%p10_p5) target bundleno = 2 (0x2), region = 76 }

</bundles_post_ra>
